<compile_context>
chip_gen: v6e
topology: v6e:2x2x1
jax: 0.10.0
libtpu: 0.0.40
codegen_flags: <defaults>
</compile_context>

<pallas_src>
import jax
import jax.numpy as jnp
from jax.experimental import pallas as pl
from jax.experimental.pallas import tpu as pltpu

HIDDEN_DIMS = [128, 256]
INPUT_DIM = 2

_MXU_LANE = 128
_DEFAULT_VMEM_FALLBACK = 64 << 20  # v7x per-TC capacity: safe lower bound


def _round_up(n, m):
    return ((n + m - 1) // m) * m


def _leaky_relu(x, slope=0.2):
    # max(x, slope*x) == LeakyReLU(slope) for 0 < slope < 1.
    return jnp.maximum(x, slope * x)


def discriminator_kernel(x_ref, w1_ref, b1_ref, w2_ref, b2_ref, w3_ref, b3_ref,
                         o_ref):
    # Batch-in-lanes: columns are batch samples (lane-dense everywhere).
    #   x_ref : [2, TB]       w1_ref: [256, 2]   b1_ref: [256, 1]
    #   h1    : [256, TB]     w2_ref: [128, 256] b2_ref: [128, 1]
    #   h2    : [128, TB]     w3_ref: [1, 128]   b3_ref: [1, 1]
    #   out   : [1, TB]

    # Layer 1 (in=2): two broadcasted FMAs on the VPU.
    x0 = x_ref[0:1, :]                                   # [1, TB]
    x1 = x_ref[1:2, :]                                   # [1, TB]
    h1 = w1_ref[:, 0:1] * x0 + w1_ref[:, 1:2] * x1 + b1_ref[...]
    h1 = _leaky_relu(h1)                                 # [256, TB]

    # Layer 2 (256 -> 128): single-pass bf16 MXU matmul, f32 accumulation.
    h2 = jnp.dot(w2_ref[...].astype(jnp.bfloat16),
                 h1.astype(jnp.bfloat16),
                 preferred_element_type=jnp.float32)
    h2 = _leaky_relu(h2 + b2_ref[...])                   # [128, TB]

    # Layer 3 (128 -> 1): tiny, keep f32.
    h3 = jnp.dot(w3_ref[...], h2, preferred_element_type=jnp.float32)
    h3 = h3 + b3_ref[...]                                # [1, TB]

    # Sigmoid = exp (EUP) + approximate reciprocal (EUP).  Clamp the logit so
    # exp(-h3) cannot overflow to inf before the approx-reciprocal path.
    h3 = jnp.clip(h3, -30.0, 30.0)
    o_ref[...] = pl.reciprocal(1.0 + jnp.exp(-h3), approx=True)


def _detect_vmem_bytes():
    try:
        info = pltpu.get_tpu_info()
        cap = getattr(info, "vmem_capacity_bytes", None)
        if cap:
            return int(cap)
    except Exception:
        pass
    return _DEFAULT_VMEM_FALLBACK


def _tile_working_set_bytes(tile_b):
    # h1 f32 (1024 B/elem) + h1 bf16 copy (512) + h2 f32 (512) + sublane-
    # padded double-buffered x/out blocks (~128) + weights/compiler scratch.
    return tile_b * 2304 + (6 << 20)


def _pick_tile_b(batch, requested, vmem_bytes):
    ceiling = max(32 << 20, vmem_bytes - (8 << 20))
    if requested is None:
        # Large tiles amortize the ~0.35 us/grid-step overhead; per-generation
        # cap (v5e/v6e: 128 MiB VMEM -> 32768, v7x: 64 MiB per TC -> 16384).
        requested = 32768 if vmem_bytes >= (128 << 20) else 16384
    tile = min(_round_up(requested, _MXU_LANE), _round_up(batch, _MXU_LANE))
    # Shrink until the working set fits the per-generation VMEM ceiling.
    while tile > _MXU_LANE and _tile_working_set_bytes(tile) > ceiling:
        tile = _round_up(tile // 2, _MXU_LANE)
    # Prefer >= 2 batch tiles so dimension_semantics=("parallel",) can occupy
    # both TensorCores on v7x (costs at most one extra ~0.35 us step elsewhere).
    if batch > _MXU_LANE and _round_up(batch, tile) // tile < 2:
        tile = _round_up(-(-batch // 2), _MXU_LANE)
    return tile, ceiling


def _build_discriminator_call(din, tile_b, b_pad, shapes, vmem_limit,
                              single_buffer_weights):
    grid = (b_pad // tile_b,)
    const = lambda i: (0, 0)  # grid-invariant blocks stay resident
    if single_buffer_weights:
        wspec = lambda s: pl.BlockSpec(s, const, pipeline_mode=pl.Buffered(1))
    else:
        wspec = lambda s: pl.BlockSpec(s, const)
    w1s, b1s, w2s, b2s, w3s, b3s = shapes
    return pl.pallas_call(
        discriminator_kernel,
        out_shape=jax.ShapeDtypeStruct((1, b_pad), jnp.float32),
        grid=grid,
        in_specs=[
            pl.BlockSpec((din, tile_b), lambda i: (0, i)),   # x^T batch tile
            wspec(w1s), wspec(b1s),                          # [256,2], [256,1]
            wspec(w2s), wspec(b2s),                          # [128,256],[128,1]
            wspec(w3s), wspec(b3s),                          # [1,128], [1,1]
        ],
        out_specs=pl.BlockSpec((1, tile_b), lambda i: (0, i)),
        compiler_params=pltpu.CompilerParams(
            dimension_semantics=("parallel",),     # megacore / v7x dual-TC
            vmem_limit_bytes=int(vmem_limit),
        ),
    )


_single_buffer_weights_supported = True  # flipped off if Buffered(1) rejected


def discriminator_forward(x, params, *, tile_b=None, feature_major=False):
    """Forward pass of the GAN discriminator.

    x: [B, 2] f32 (PyTorch layout), or [2, B] with feature_major=True (skips
       the host-side transpose; store x feature-major upstream when possible).
    params: PyTorch-layout ((W[out,in], b[out]),) * 3.
    Returns sigmoid probabilities of shape [B, 1].
    """
    global _single_buffer_weights_supported
    (w1, b1), (w2, b2), (w3, b3) = params

    if feature_major:
        din, B = x.shape
        x_t = x
    else:
        B, din = x.shape
        x_t = x.T                                  # tiny [2, B] transpose
    assert din == INPUT_DIM

    vmem_bytes = _detect_vmem_bytes()
    tile_b, vmem_limit = _pick_tile_b(B, tile_b, vmem_bytes)
    b_pad = _round_up(B, tile_b)
    if b_pad != B:
        # TODO(synk): store x pre-padded / feature-major upstream so this
        # host-side pad materialization disappears entirely.
        x_t = jnp.pad(x_t, ((0, 0), (0, b_pad - B)))

    args = (x_t,
            w1, b1.reshape(-1, 1),
            w2, b2.reshape(-1, 1),
            w3, b3.reshape(-1, 1))
    shapes = (w1.shape, (b1.shape[0], 1), w2.shape, (b2.shape[0], 1),
              w3.shape, (w3.shape[0], 1))

    modes = (True, False) if _single_buffer_weights_supported else (False,)
    last_err = None
    for single_buf in modes:
        try:
            call = _build_discriminator_call(din, tile_b, b_pad, shapes,
                                             vmem_limit, single_buf)
            out = call(*args)
            break
        except Exception as err:
            if single_buf:
                # pipeline_mode=pl.Buffered(1) not supported by this Pallas
                # build; fall back to default double buffering.
                _single_buffer_weights_supported = False
                last_err = err
                continue
            raise
    else:
        raise last_err

    return out[:, :B].reshape(B, 1)


def init_params(key):
    """Deterministic init matching PyTorch nn.Linear defaults
    (uniform(-1/sqrt(fan_in), 1/sqrt(fan_in))), native [out, in] layout."""
    dims = [(INPUT_DIM, HIDDEN_DIMS[1]),        # Linear(2, 256)
            (HIDDEN_DIMS[1], HIDDEN_DIMS[0]),   # Linear(256, 128)
            (HIDDEN_DIMS[0], 1)]                # Linear(128, 1)
    params = []
    for fan_in, fan_out in dims:
        key, kw, kb = jax.random.split(key, 3)
        bound = 1.0 / (fan_in ** 0.5)
        w = jax.random.uniform(kw, (fan_out, fan_in), jnp.float32,
                               minval=-bound, maxval=bound)
        b = jax.random.uniform(kb, (fan_out,), jnp.float32,
                               minval=-bound, maxval=bound)
        params.append((w, b))
    return params


def discriminator_ref(x, params):
    """Pure-JAX fp32 reference (exact sigmoid) for correctness check."""
    (w1, b1), (w2, b2), (w3, b3) = params
    h = x @ w1.T + b1
    h = jnp.where(h > 0, h, 0.2 * h)
    h = h @ w2.T + b2
    h = jnp.where(h > 0, h, 0.2 * h)
    return jax.nn.sigmoid(h @ w3.T + b3)


if __name__ == "__main__":
    key = jax.random.PRNGKey(0)
    key, kx, kx2 = jax.random.split(key, 3)
    params = init_params(key)

    # Small primary test (single tile).
    B = 8
    x = jax.random.normal(kx, (B, INPUT_DIM), jnp.float32)
    out = jax.block_until_ready(discriminator_forward(x, params))
    ref = discriminator_ref(x, params)
    assert out.shape == (B, 1), out.shape
    # Tolerance covers the bf16 layer-2 matmul (f32-accumulated) and the EUP
    # approximate reciprocal in the sigmoid.
    assert jnp.allclose(out, ref, atol=1e-2), (out, ref)

    # Ragged batch with auto tile selection -> >=2 tiles (parallel grid axis).
    B2 = 200
    x2 = jax.random.normal(kx2, (B2, INPUT_DIM), jnp.float32)
    out2 = jax.block_until_ready(discriminator_forward(x2, params))
    ref2 = discriminator_ref(x2, params)
    assert out2.shape == (B2, 1), out2.shape
    assert jnp.allclose(out2, ref2, atol=1e-2)

    # Feature-major fast path (no host-side transpose) + explicit small tile.
    out3 = jax.block_until_ready(
        discriminator_forward(x2.T, params, feature_major=True, tile_b=128))
    assert out3.shape == (B2, 1), out3.shape
    assert jnp.allclose(out3, ref2, atol=1e-2)

    print("KERNEL_OK")
</pallas_src>

<mosaic_0001>
module attributes {stable_mosaic.version = 11 : i64} {
  func.func @discriminator_kernel(%arg0: i32, %arg1: memref<2x128xf32, #tpu.memory_space<vmem>>, %arg2: memref<256x2xf32, #tpu.memory_space<vmem>>, %arg3: memref<256x1xf32, #tpu.memory_space<vmem>>, %arg4: memref<128x256xf32, #tpu.memory_space<vmem>>, %arg5: memref<128x1xf32, #tpu.memory_space<vmem>>, %arg6: memref<1x128xf32, #tpu.memory_space<vmem>>, %arg7: memref<1x1xf32, #tpu.memory_space<vmem>>, %arg8: memref<1x128xf32, #tpu.memory_space<vmem>>) attributes {dimension_semantics = [#tpu.dimension_semantics<parallel>], iteration_bounds = array<i64: 1>, scalar_prefetch = 0 : i64, scratch_operands = 0 : i64, tpu.core_type = #tpu.core_type<tc>, window_params = [{transform_indices = @transform_0, window_bounds = array<i64: 2, 128>}, {pipeline_mode = #tpu.pipeline_mode<synchronous>, transform_indices = @transform_1, window_bounds = array<i64: 256, 2>}, {pipeline_mode = #tpu.pipeline_mode<synchronous>, transform_indices = @transform_2, window_bounds = array<i64: 256, 1>}, {pipeline_mode = #tpu.pipeline_mode<synchronous>, transform_indices = @transform_3, window_bounds = array<i64: 128, 256>}, {pipeline_mode = #tpu.pipeline_mode<synchronous>, transform_indices = @transform_4, window_bounds = array<i64: 128, 1>}, {pipeline_mode = #tpu.pipeline_mode<synchronous>, transform_indices = @transform_5, window_bounds = array<i64: 1, 128>}, {pipeline_mode = #tpu.pipeline_mode<synchronous>, transform_indices = @transform_6, window_bounds = array<i64: 1, 1>}, {transform_indices = @transform_7, window_bounds = array<i64: 1, 128>}]} {
    %c0 = arith.constant 0 : index
    %c0_0 = arith.constant 0 : index
    %0 = vector.load %arg1[%c0, %c0_0] : memref<2x128xf32, #tpu.memory_space<vmem>>, vector<1x128xf32>
    %c1 = arith.constant 1 : index
    %c0_1 = arith.constant 0 : index
    %1 = vector.load %arg1[%c1, %c0_1] : memref<2x128xf32, #tpu.memory_space<vmem>>, vector<1x128xf32>
    %c0_2 = arith.constant 0 : index
    %c0_3 = arith.constant 0 : index
    %2 = vector.load %arg2[%c0_2, %c0_3] : memref<256x2xf32, #tpu.memory_space<vmem>>, vector<256x1xf32>
    %3 = vector.broadcast %2 : vector<256x1xf32> to vector<256x128xf32>
    %4 = vector.broadcast %0 : vector<1x128xf32> to vector<256x128xf32>
    %5 = arith.mulf %3, %4 : vector<256x128xf32>
    %c0_4 = arith.constant 0 : index
    %c1_5 = arith.constant 1 : index
    %6 = vector.load %arg2[%c0_4, %c1_5] : memref<256x2xf32, #tpu.memory_space<vmem>>, vector<256x1xf32>
    %7 = vector.broadcast %6 : vector<256x1xf32> to vector<256x128xf32>
    %8 = vector.broadcast %1 : vector<1x128xf32> to vector<256x128xf32>
    %9 = arith.mulf %7, %8 : vector<256x128xf32>
    %10 = arith.addf %5, %9 : vector<256x128xf32>
    %c0_6 = arith.constant 0 : index
    %c0_7 = arith.constant 0 : index
    %11 = vector.load %arg3[%c0_6, %c0_7] : memref<256x1xf32, #tpu.memory_space<vmem>>, vector<256x1xf32>
    %12 = vector.broadcast %11 : vector<256x1xf32> to vector<256x128xf32>
    %13 = arith.addf %10, %12 : vector<256x128xf32>
    %cst = arith.constant 2.000000e-01 : f32
    %14 = vector.broadcast %cst : f32 to vector<256x128xf32>
    %15 = arith.mulf %14, %13 : vector<256x128xf32>
    %16 = arith.maximumf %13, %15 : vector<256x128xf32>
    %c0_8 = arith.constant 0 : index
    %c0_9 = arith.constant 0 : index
    %17 = vector.load %arg4[%c0_8, %c0_9] : memref<128x256xf32, #tpu.memory_space<vmem>>, vector<128x256xf32>
    %18 = arith.truncf %17 : vector<128x256xf32> to vector<128x256xbf16>
    %19 = arith.truncf %16 : vector<256x128xf32> to vector<256x128xbf16>
    %cst_10 = arith.constant dense<0.000000e+00> : vector<128x128xf32>
    %20 = tpu.matmul %18, %19, %cst_10 {dimension_numbers = #tpu.dot_dimension_numbers<[1], [0], [0], [1], [0, 0, 1, 1], [], []>} : vector<128x256xbf16>, vector<256x128xbf16>, vector<128x128xf32> -> vector<128x128xf32>
    %c0_11 = arith.constant 0 : index
    %c0_12 = arith.constant 0 : index
    %21 = vector.load %arg5[%c0_11, %c0_12] : memref<128x1xf32, #tpu.memory_space<vmem>>, vector<128x1xf32>
    %22 = vector.broadcast %21 : vector<128x1xf32> to vector<128x128xf32>
    %23 = arith.addf %20, %22 : vector<128x128xf32>
    %cst_13 = arith.constant 2.000000e-01 : f32
    %24 = vector.broadcast %cst_13 : f32 to vector<128x128xf32>
    %25 = arith.mulf %24, %23 : vector<128x128xf32>
    %26 = arith.maximumf %23, %25 : vector<128x128xf32>
    %c0_14 = arith.constant 0 : index
    %c0_15 = arith.constant 0 : index
    %27 = vector.load %arg6[%c0_14, %c0_15] : memref<1x128xf32, #tpu.memory_space<vmem>>, vector<1x128xf32>
    %cst_16 = arith.constant dense<0.000000e+00> : vector<1x128xf32>
    %28 = tpu.matmul %27, %26, %cst_16 {dimension_numbers = #tpu.dot_dimension_numbers<[1], [0], [0], [1], [0, 0, 1, 1], [], []>} : vector<1x128xf32>, vector<128x128xf32>, vector<1x128xf32> -> vector<1x128xf32>
    %c0_17 = arith.constant 0 : index
    %c0_18 = arith.constant 0 : index
    %29 = vector.load %arg7[%c0_17, %c0_18] : memref<1x1xf32, #tpu.memory_space<vmem>>, vector<1x1xf32>
    %30 = vector.broadcast %29 : vector<1x1xf32> to vector<1x128xf32>
    %31 = arith.addf %28, %30 : vector<1x128xf32>
    %cst_19 = arith.constant -3.000000e+01 : f32
    %cst_20 = arith.constant 3.000000e+01 : f32
    %32 = vector.broadcast %cst_19 : f32 to vector<1x128xf32>
    %33 = arith.maximumf %32, %31 : vector<1x128xf32>
    %34 = vector.broadcast %cst_20 : f32 to vector<1x128xf32>
    %35 = arith.minimumf %34, %33 : vector<1x128xf32>
    %cst_21 = arith.constant 0.000000e+00 : f32
    %36 = vector.broadcast %cst_21 : f32 to vector<1x128xf32>
    %37 = arith.subf %36, %35 : vector<1x128xf32>
    %38 = math.exp %37 : vector<1x128xf32>
    %cst_22 = arith.constant 1.000000e+00 : f32
    %39 = vector.broadcast %cst_22 : f32 to vector<1x128xf32>
    %40 = arith.addf %39, %38 : vector<1x128xf32>
    %41 = tpu.reciprocal %40 {approx = true} : vector<1x128xf32> -> vector<1x128xf32>
    %c0_23 = arith.constant 0 : index
    %c0_24 = arith.constant 0 : index
    %42 = vector.load %arg8[%c0_23, %c0_24] : memref<1x128xf32, #tpu.memory_space<vmem>>, vector<1x128xf32>
    tpu.vector_store %arg8[%c0_23, %c0_24], %41 {strides = array<i32>} : memref<1x128xf32, #tpu.memory_space<vmem>>, vector<1x128xf32>,
    return
  }
  func.func @transform_0(%arg0: i32) -> (i32, i32) {
    %c0_i32 = arith.constant 0 : i32
    %c0_i32_0 = arith.constant 0 : i32
    return %c0_i32, %arg0 : i32, i32
  }
  func.func @transform_1(%arg0: i32) -> (i32, i32) {
    %c0_i32 = arith.constant 0 : i32
    %c0_i32_0 = arith.constant 0 : i32
    %c0_i32_1 = arith.constant 0 : i32
    return %c0_i32, %c0_i32_0 : i32, i32
  }
  func.func @transform_2(%arg0: i32) -> (i32, i32) {
    %c0_i32 = arith.constant 0 : i32
    %c0_i32_0 = arith.constant 0 : i32
    %c0_i32_1 = arith.constant 0 : i32
    return %c0_i32, %c0_i32_0 : i32, i32
  }
  func.func @transform_3(%arg0: i32) -> (i32, i32) {
    %c0_i32 = arith.constant 0 : i32
    %c0_i32_0 = arith.constant 0 : i32
    %c0_i32_1 = arith.constant 0 : i32
    return %c0_i32, %c0_i32_0 : i32, i32
  }
  func.func @transform_4(%arg0: i32) -> (i32, i32) {
    %c0_i32 = arith.constant 0 : i32
    %c0_i32_0 = arith.constant 0 : i32
    %c0_i32_1 = arith.constant 0 : i32
    return %c0_i32, %c0_i32_0 : i32, i32
  }
  func.func @transform_5(%arg0: i32) -> (i32, i32) {
    %c0_i32 = arith.constant 0 : i32
    %c0_i32_0 = arith.constant 0 : i32
    %c0_i32_1 = arith.constant 0 : i32
    return %c0_i32, %c0_i32_0 : i32, i32
  }
  func.func @transform_6(%arg0: i32) -> (i32, i32) {
    %c0_i32 = arith.constant 0 : i32
    %c0_i32_0 = arith.constant 0 : i32
    %c0_i32_1 = arith.constant 0 : i32
    return %c0_i32, %c0_i32_0 : i32, i32
  }
  func.func @transform_7(%arg0: i32) -> (i32, i32) {
    %c0_i32 = arith.constant 0 : i32
    %c0_i32_0 = arith.constant 0 : i32
    return %c0_i32, %arg0 : i32, i32
  }
}

module attributes {stable_mosaic.version = 11 : i64} {
  func.func @discriminator_kernel(%arg0: i32, %arg1: memref<2x128xf32, #tpu.memory_space<vmem>>, %arg2: memref<256x2xf32, #tpu.memory_space<vmem>>, %arg3: memref<256x1xf32, #tpu.memory_space<vmem>>, %arg4: memref<128x256xf32, #tpu.memory_space<vmem>>, %arg5: memref<128x1xf32, #tpu.memory_space<vmem>>, %arg6: memref<1x128xf32, #tpu.memory_space<vmem>>, %arg7: memref<1x1xf32, #tpu.memory_space<vmem>>, %arg8: memref<1x128xf32, #tpu.memory_space<vmem>>) attributes {dimension_semantics = [#tpu.dimension_semantics<parallel>], iteration_bounds = array<i64: 1>, scalar_prefetch = 0 : i64, scratch_operands = 0 : i64, tpu.core_type = #tpu.core_type<tc>, window_params = [{transform_indices = @transform_0, window_bounds = array<i64: 2, 128>}, {pipeline_mode = #tpu.pipeline_mode<synchronous>, transform_indices = @transform_1, window_bounds = array<i64: 256, 2>}, {pipeline_mode = #tpu.pipeline_mode<synchronous>, transform_indices = @transform_2, window_bounds = array<i64: 256, 1>}, {pipeline_mode = #tpu.pipeline_mode<synchronous>, transform_indices = @transform_3, window_bounds = array<i64: 128, 256>}, {pipeline_mode = #tpu.pipeline_mode<synchronous>, transform_indices = @transform_4, window_bounds = array<i64: 128, 1>}, {pipeline_mode = #tpu.pipeline_mode<synchronous>, transform_indices = @transform_5, window_bounds = array<i64: 1, 128>}, {pipeline_mode = #tpu.pipeline_mode<synchronous>, transform_indices = @transform_6, window_bounds = array<i64: 1, 1>}, {transform_indices = @transform_7, window_bounds = array<i64: 1, 128>}]} {
    %c0 = arith.constant 0 : index
    %c0_0 = arith.constant 0 : index
    %0 = vector.load %arg1[%c0, %c0_0] : memref<2x128xf32, #tpu.memory_space<vmem>>, vector<1x128xf32>
    %c1 = arith.constant 1 : index
    %c0_1 = arith.constant 0 : index
    %1 = vector.load %arg1[%c1, %c0_1] : memref<2x128xf32, #tpu.memory_space<vmem>>, vector<1x128xf32>
    %c0_2 = arith.constant 0 : index
    %c0_3 = arith.constant 0 : index
    %2 = vector.load %arg2[%c0_2, %c0_3] : memref<256x2xf32, #tpu.memory_space<vmem>>, vector<256x1xf32>
    %3 = vector.broadcast %2 : vector<256x1xf32> to vector<256x128xf32>
    %4 = vector.broadcast %0 : vector<1x128xf32> to vector<256x128xf32>
    %5 = arith.mulf %3, %4 : vector<256x128xf32>
    %c0_4 = arith.constant 0 : index
    %c1_5 = arith.constant 1 : index
    %6 = vector.load %arg2[%c0_4, %c1_5] : memref<256x2xf32, #tpu.memory_space<vmem>>, vector<256x1xf32>
    %7 = vector.broadcast %6 : vector<256x1xf32> to vector<256x128xf32>
    %8 = vector.broadcast %1 : vector<1x128xf32> to vector<256x128xf32>
    %9 = arith.mulf %7, %8 : vector<256x128xf32>
    %10 = arith.addf %5, %9 : vector<256x128xf32>
    %c0_6 = arith.constant 0 : index
    %c0_7 = arith.constant 0 : index
    %11 = vector.load %arg3[%c0_6, %c0_7] : memref<256x1xf32, #tpu.memory_space<vmem>>, vector<256x1xf32>
    %12 = vector.broadcast %11 : vector<256x1xf32> to vector<256x128xf32>
    %13 = arith.addf %10, %12 : vector<256x128xf32>
    %cst = arith.constant 2.000000e-01 : f32
    %14 = vector.broadcast %cst : f32 to vector<256x128xf32>
    %15 = arith.mulf %14, %13 : vector<256x128xf32>
    %16 = arith.maximumf %13, %15 : vector<256x128xf32>
    %c0_8 = arith.constant 0 : index
    %c0_9 = arith.constant 0 : index
    %17 = vector.load %arg4[%c0_8, %c0_9] : memref<128x256xf32, #tpu.memory_space<vmem>>, vector<128x256xf32>
    %18 = arith.truncf %17 : vector<128x256xf32> to vector<128x256xbf16>
    %19 = arith.truncf %16 : vector<256x128xf32> to vector<256x128xbf16>
    %cst_10 = arith.constant dense<0.000000e+00> : vector<128x128xf32>
    %20 = tpu.matmul %18, %19, %cst_10 {dimension_numbers = #tpu.dot_dimension_numbers<[1], [0], [0], [1], [0, 0, 1, 1], [], []>} : vector<128x256xbf16>, vector<256x128xbf16>, vector<128x128xf32> -> vector<128x128xf32>
    %c0_11 = arith.constant 0 : index
    %c0_12 = arith.constant 0 : index
    %21 = vector.load %arg5[%c0_11, %c0_12] : memref<128x1xf32, #tpu.memory_space<vmem>>, vector<128x1xf32>
    %22 = vector.broadcast %21 : vector<128x1xf32> to vector<128x128xf32>
    %23 = arith.addf %20, %22 : vector<128x128xf32>
    %cst_13 = arith.constant 2.000000e-01 : f32
    %24 = vector.broadcast %cst_13 : f32 to vector<128x128xf32>
    %25 = arith.mulf %24, %23 : vector<128x128xf32>
    %26 = arith.maximumf %23, %25 : vector<128x128xf32>
    %c0_14 = arith.constant 0 : index
    %c0_15 = arith.constant 0 : index
    %27 = vector.load %arg6[%c0_14, %c0_15] : memref<1x128xf32, #tpu.memory_space<vmem>>, vector<1x128xf32>
    %cst_16 = arith.constant dense<0.000000e+00> : vector<1x128xf32>
    %28 = tpu.matmul %27, %26, %cst_16 {dimension_numbers = #tpu.dot_dimension_numbers<[1], [0], [0], [1], [0, 0, 1, 1], [], []>} : vector<1x128xf32>, vector<128x128xf32>, vector<1x128xf32> -> vector<1x128xf32>
    %c0_17 = arith.constant 0 : index
    %c0_18 = arith.constant 0 : index
    %29 = vector.load %arg7[%c0_17, %c0_18] : memref<1x1xf32, #tpu.memory_space<vmem>>, vector<1x1xf32>
    %30 = vector.broadcast %29 : vector<1x1xf32> to vector<1x128xf32>
    %31 = arith.addf %28, %30 : vector<1x128xf32>
    %cst_19 = arith.constant -3.000000e+01 : f32
    %cst_20 = arith.constant 3.000000e+01 : f32
    %32 = vector.broadcast %cst_19 : f32 to vector<1x128xf32>
    %33 = arith.maximumf %32, %31 : vector<1x128xf32>
    %34 = vector.broadcast %cst_20 : f32 to vector<1x128xf32>
    %35 = arith.minimumf %34, %33 : vector<1x128xf32>
    %cst_21 = arith.constant 0.000000e+00 : f32
    %36 = vector.broadcast %cst_21 : f32 to vector<1x128xf32>
    %37 = arith.subf %36, %35 : vector<1x128xf32>
    %38 = math.exp %37 : vector<1x128xf32>
    %cst_22 = arith.constant 1.000000e+00 : f32
    %39 = vector.broadcast %cst_22 : f32 to vector<1x128xf32>
    %40 = arith.addf %39, %38 : vector<1x128xf32>
    %41 = tpu.reciprocal %40 {approx = true} : vector<1x128xf32> -> vector<1x128xf32>
    %c0_23 = arith.constant 0 : index
    %c0_24 = arith.constant 0 : index
    %42 = vector.load %arg8[%c0_23, %c0_24] : memref<1x128xf32, #tpu.memory_space<vmem>>, vector<1x128xf32>
    tpu.vector_store %arg8[%c0_23, %c0_24], %41 {strides = array<i32>} : memref<1x128xf32, #tpu.memory_space<vmem>>, vector<1x128xf32>,
    return
  }
  func.func @transform_0(%arg0: i32) -> (i32, i32) {
    %c0_i32 = arith.constant 0 : i32
    %c0_i32_0 = arith.constant 0 : i32
    return %c0_i32, %arg0 : i32, i32
  }
  func.func @transform_1(%arg0: i32) -> (i32, i32) {
    %c0_i32 = arith.constant 0 : i32
    %c0_i32_0 = arith.constant 0 : i32
    %c0_i32_1 = arith.constant 0 : i32
    return %c0_i32, %c0_i32_0 : i32, i32
  }
  func.func @transform_2(%arg0: i32) -> (i32, i32) {
    %c0_i32 = arith.constant 0 : i32
    %c0_i32_0 = arith.constant 0 : i32
    %c0_i32_1 = arith.constant 0 : i32
    return %c0_i32, %c0_i32_0 : i32, i32
  }
  func.func @transform_3(%arg0: i32) -> (i32, i32) {
    %c0_i32 = arith.constant 0 : i32
    %c0_i32_0 = arith.constant 0 : i32
    %c0_i32_1 = arith.constant 0 : i32
    return %c0_i32, %c0_i32_0 : i32, i32
  }
  func.func @transform_4(%arg0: i32) -> (i32, i32) {
    %c0_i32 = arith.constant 0 : i32
    %c0_i32_0 = arith.constant 0 : i32
    %c0_i32_1 = arith.constant 0 : i32
    return %c0_i32, %c0_i32_0 : i32, i32
  }
  func.func @transform_5(%arg0: i32) -> (i32, i32) {
    %c0_i32 = arith.constant 0 : i32
    %c0_i32_0 = arith.constant 0 : i32
    %c0_i32_1 = arith.constant 0 : i32
    return %c0_i32, %c0_i32_0 : i32, i32
  }
  func.func @transform_6(%arg0: i32) -> (i32, i32) {
    %c0_i32 = arith.constant 0 : i32
    %c0_i32_0 = arith.constant 0 : i32
    %c0_i32_1 = arith.constant 0 : i32
    return %c0_i32, %c0_i32_0 : i32, i32
  }
  func.func @transform_7(%arg0: i32) -> (i32, i32) {
    %c0_i32 = arith.constant 0 : i32
    %c0_i32_0 = arith.constant 0 : i32
    return %c0_i32, %arg0 : i32, i32
  }
}

</mosaic_0001>

<bundles_post_ra>
// kernel: tpu_custom_call.1
= control target key start
LH: loop header
LB: loop body
LE: loop exit
PB: predicated region body
PF: predicated region fallthrough
CT: control target
= control target key end

     0   :  { %s2040_s0 = inlined_call_operand.vmem [shape: f32[2,128], index: 0, kind: input, shape index: {}]   ;;  %s2041_s1 = inlined_call_operand.vmem [shape: f32[256,2], index: 1, kind: input, shape index: {}]   ;;  %s2042_s2 = inlined_call_operand.vmem [shape: f32[256,1], index: 2, kind: input, shape index: {}]   ;;  %s2043_s3 = inlined_call_operand.vmem [shape: f32[128,256], index: 3, kind: input, shape index: {}]   ;;  %s2044_s4 = inlined_call_operand.vmem [shape: f32[128,1], index: 4, kind: input, shape index: {}]   ;;  %s2045_s5 = inlined_call_operand.vmem [shape: f32[1,128], index: 5, kind: input, shape index: {}]   ;;  %s2046_s6 = inlined_call_operand.<no memory space> [shape: f32[1,1], index: 6, kind: input, shape index: {}]   ;;  %s2047_s7 = inlined_call_operand.hbm [shape: f32[1,128], index: 7, kind: output, shape index: {}]  }
   0x1   :  { %v12_v0 = vstv %s2046_s6 }
   0x2   :  { %13 = vst [vmem:[#allocation2] sm:$0x1] %v12_v0 }
   0x3   :  { %v62_v1 = vld [vmem:[%s2041_s1 + $0xf0] sm:$0xff]  ;;  %v1336_v3 = vmov 1   ;;  %v63_v4 = vld [vmem:[%s2041_s1 + $0xf8] sm:$0xff]  ;;  %v1401_v5 = vld [vmem:[%s2041_s1 + $0x60] sm:$0xff]  ;;  %v1337_v8 = vmov 0  }
   0x4   :  { %v1390_v2 = vld [vmem:[%s2041_s1 + $0x70] sm:$0xff]  ;;  %1278 = vset.pattern.permute.xlu0 %v1336_v3  ;;  %1276 = vset.pattern.permute.xlu1 %v1336_v3  ;;  %v47_v7 = vld [vmem:[%s2041_s1 + $0x78] sm:$0xff] }
   0x5   :  { %381 = vperm.xlu1 %1276, %v62_v1   ;;  %317 = vperm.xlu0 %1278, %v1390_v2   ;;  %v58_v6 = vld [vmem:[%s2041_s1 + $0xd0] sm:$0xff] }
   0x6   :  { %v42_v9 = vld [vmem:[%s2041_s1 + $0x50] sm:$0xff] }
   0x9   :  { %385 = vperm.xlu1 %1276, %v63_v4   ;;  %309 = vperm.xlu0 %1278, %v1401_v5  }
   0xd   :  { %1277 = vset.pattern.permute.xlu1 %v1337_v8  ;;  %365 = vperm.xlu0 %1278, %v58_v6  }
   0xe   :  { %141 = vperm.xlu1 %1277, %v47_v7  }
  0x11   :  { %301 = vperm.xlu0 %1278, %v42_v9  }
  0x12   :  { %14 = vsyncpa [#allocation4], 0  ;;  %1279 = vset.pattern.permute.xlu1 %v1336_v3  ;;  %v1418_v10 = vld [vmem:[%s2041_s1 + $0xc0] sm:$0xff]  ;;  %v1434_v13 = vld [vmem:[%s2041_s1 + $0xb0] sm:$0xff]  ;;  %vm1339_vm0 = vmmov 0  }
  0x13   :  { %321 = vperm.xlu1 %1279, %v47_v7   ;;  %v60_v11 = vld [vmem:[%s2041_s1 + $0xe0] sm:$0xff]  ;;  %v61_v14 = vld [vmem:[%s2041_s1 + $0xe8] sm:$0xff]  ;;  %v1444_v15 = vld [vmem:[%s2041_s1 + $0x30] sm:$0xff] }
  0x14   :  { %v1427_v12 = vld [vmem:[%s2041_s1 + $0x40] sm:$0xff]  ;;  %v487_v17 = vld [vmem:[%s2042_s2 + $0xf8] sm:$0xff]  ;;  %v45_v19 = vld [vmem:[%s2041_s1 + $0x68] sm:$0xff] }
  0x15   :  { %357 = vperm.xlu0 %1278, %v1418_v10   ;;  %v1450_v16 = vld [vmem:[%s2041_s1 + $0xa0] sm:$0xff]  ;;  %v1469_v20 = vld [vmem:[%s2041_s1 + $0x90] sm:$0xff]  ;;  %v59_v25 = vld [vmem:[%s2041_s1 + $0xd8] sm:$0xff] }
  0x16   :  { %v1460_v18 = vld [vmem:[%s2041_s1 + $0x20] sm:$0xff]  ;;  %v1476_v21 = vld [vmem:[%s2041_s1 + $0x10] sm:$0xff]  ;;  %v43_v27 = vld [vmem:[%s2041_s1 + $0x58] sm:$0xff] }
  0x17   :  { %1280 = vset.pattern.permute.xlu1 %v1337_v8  ;;  %v470_v22 = vld [vmem:[%s2042_s2 + $0x70] sm:$0xff]  ;;  %v1485_v23 = vld [vmem:[%s2041_s1 + $0x80] sm:$0xff]  ;;  %v471_v29 = vld [vmem:[%s2042_s2 + $0x78] sm:$0xff] }
  0x18   :  { %206 = vperm.xlu1 %1280, %v60_v11   ;;  %v1492_v24 = vld [vmem:[%s2041_s1] sm:$0xff]  ;;  %v486_v28 = vld [vmem:[%s2042_s2 + $0xf0] sm:$0xff]  ;;  %v485_v31 = vld [vmem:[%s2042_s2 + $0xe8] sm:$0xff] }
  0x19   :  { %293 = vperm.xlu0 %1278, %v1427_v12   ;;  %v484_v26 = vld [vmem:[%s2042_s2 + $0xe0] sm:$0xff]  ;;  %v469_v32 = vld [vmem:[%s2042_s2 + $0x68] sm:$0xff]  ;;  %v483_v34 = vld [vmem:[%s2042_s2 + $0xd8] sm:$0xff] }
  0x1a   :  { %v468_v30 = vld [vmem:[%s2042_s2 + $0x60] sm:$0xff]  ;;  %v57_v33 = vld [vmem:[%s2041_s1 + $0xc8] sm:$0xff]  ;;  %v467_v35 = vld [vmem:[%s2042_s2 + $0x58] sm:$0xff] }
  0x1b   :  { %v482_v36 = vld [vmem:[%s2042_s2 + $0xd0] sm:$0xff]  ;;  %v481_v37 = vld [vmem:[%s2042_s2 + $0xc8] sm:$0xff]  ;;  %v479_v40 = vld [vmem:[%s2042_s2 + $0xb8] sm:$0xff] }
  0x1c   :  { %1281 = vset.pattern.permute.xlu1 %v1336_v3  ;;  %v465_v38 = vld [vmem:[%s2042_s2 + $0x48] sm:$0xff]  ;;  %v463_v41 = vld [vmem:[%s2042_s2 + $0x38] sm:$0xff]  ;;  %v466_v43 = vld [vmem:[%s2042_s2 + $0x50] sm:$0xff] }
  0x1d   :  { %373 = vperm.xlu1 %1281, %v60_v11   ;;  %349 = vperm.xlu0 %1278, %v1434_v13   ;;  %v41_v39 = vld [vmem:[%s2041_s1 + $0x48] sm:$0xff]  ;;  %v475_v45 = vld [vmem:[%s2042_s2 + $0x98] sm:$0xff]  ;;  %v456_v52 = vld [vmem:[%s2042_s2] sm:$0xff] }
  0x1e   :  { %v477_v42 = vld [vmem:[%s2042_s2 + $0xa8] sm:$0xff]  ;;  %v55_v48 = vld [vmem:[%s2041_s1 + $0xb8] sm:$0xff]  ;;  %v480_v55 = vld [vmem:[%s2042_s2 + $0xc0] sm:$0xff] }
  0x1f   :  { %v461_v44 = vld [vmem:[%s2042_s2 + $0x28] sm:$0xff]  ;;  %v459_v49 = vld [vmem:[%s2042_s2 + $0x18] sm:$0xff] }
  0x20   :  { %v823_v56 = vld [vmem:[%s2044_s4 + $0x78] sm:$0xff]  ;;  %v821_v59 = vld [vmem:[%s2044_s4 + $0x68] sm:$0xff] }
  0x21   :  { %377 = vperm.xlu1 %1281, %v61_v14   ;;  %285 = vperm.xlu0 %1278, %v1444_v15   ;;  %v39_v62 = vld [vmem:[%s2041_s1 + $0x38] sm:$0xff] }
  0x22   :  { %v819_v63 = vld [vmem:[%s2044_s4 + $0x58] sm:$0xff] }
  0x25   :  { %1282 = vset.pattern.permute.xlu1 %v1337_v8  ;;  %341 = vperm.xlu0 %1278, %v1450_v16  }
  0x26   :  { %645 = vperm.xlu1 %1282, %v487_v17   ;;  %v53_v17 = vld [vmem:[%s2041_s1 + $0xa8] sm:$0xff] }
  0x29   :  { %277 = vperm.xlu0 %1278, %v1460_v18  }
  0x2a   :  { %131 = vperm.xlu1 %1282, %v45_v19  }
  0x2d   :  { %333 = vperm.xlu0 %1278, %v1469_v20  }
  0x2e   :  { %1283 = vset.pattern.permute.xlu1 %v1336_v3 }
  0x2f   :  { %313 = vperm.xlu1 %1283, %v45_v19   ;;  %v809_v19 = vld [vmem:[%s2044_s4 + $0x8] sm:$0xff] }
  0x31   :  { %269 = vperm.xlu0 %1278, %v1476_v21  }
  0x33   :  { %1284 = vset.pattern.permute.xlu1 %v1337_v8 }
  0x34   :  { %560 = vperm.xlu1 %1284, %v470_v22  }
  0x35   :  { %325 = vperm.xlu0 %1278, %v1485_v23  }
  0x38   :  { %196 = vperm.xlu1 %1284, %v58_v6  }
  0x39   :  { %261 = vperm.xlu0 %1278, %v1492_v24  }
  0x3c   :  { %201 = vperm.xlu1 %1284, %v59_v25  }
  0x3d   :  { %1307 = vset.pattern.permute.xlu0 %v1337_v8 }
  0x3e   :  { %216 = vperm.xlu0 %1307, %v62_v1   ;;  %v817_v1 = vld [vmem:[%s2044_s4 + $0x48] sm:$0xff] }
  0x40   :  { %1285 = vset.pattern.permute.xlu1 %v1336_v3 }
  0x41   :  { %369 = vperm.xlu1 %1285, %v59_v25  }
  0x42   :  { %221 = vperm.xlu0 %1307, %v63_v4  }
  0x45   :  { %1286 = vset.pattern.permute.xlu1 %v1337_v8 }
  0x46   :  { %630 = vperm.xlu1 %1286, %v484_v26   ;;  %136 = vperm.xlu0 %1307, %v1390_v2  }
  0x4a   :  { %116 = vperm.xlu1 %1286, %v42_v9   ;;  %211 = vperm.xlu0 %1307, %v61_v14   ;;  %v464_v9 = vld [vmem:[%s2042_s2 + $0x40] sm:$0xff] }
  0x4e   :  { %121 = vperm.xlu1 %1286, %v43_v27   ;;  %640 = vperm.xlu0 %1307, %v486_v28   ;;  %v478_v28 = vld [vmem:[%s2042_s2 + $0xb0] sm:$0xff] }
  0x52   :  { %1287 = vset.pattern.permute.xlu1 %v1336_v3  ;;  %126 = vperm.xlu0 %1307, %v1401_v5   ;;  %v815_v5 = vld [vmem:[%s2044_s4 + $0x38] sm:$0xff] }
  0x53   :  { %305 = vperm.xlu1 %1287, %v43_v27  }
  0x56   :  { %565 = vperm.xlu0 %1307, %v471_v29  }
  0x57   :  { %1288 = vset.pattern.permute.xlu1 %v1337_v8 }
  0x58   :  { %550 = vperm.xlu1 %1288, %v468_v30  }
  0x5a   :  { %635 = vperm.xlu0 %1307, %v485_v31  }
  0x5c   :  { %186 = vperm.xlu1 %1288, %v1418_v10   ;;  %v813_v10 = vld [vmem:[%s2044_s4 + $0x28] sm:$0xff] }
  0x5e   :  { %555 = vperm.xlu0 %1307, %v469_v32  }
  0x60   :  { %191 = vperm.xlu1 %1288, %v57_v33  }
  0x62   :  { %625 = vperm.xlu0 %1307, %v483_v34  }
  0x64   :  { %1289 = vset.pattern.permute.xlu1 %v1336_v3 }
  0x65   :  { %361 = vperm.xlu1 %1289, %v57_v33   ;;  %v37_v33 = vld [vmem:[%s2041_s1 + $0x28] sm:$0xff] }
  0x66   :  { %545 = vperm.xlu0 %1307, %v467_v35  }
  0x69   :  { %1290 = vset.pattern.permute.xlu1 %v1337_v8 }
  0x6a   :  { %620 = vperm.xlu1 %1290, %v482_v36   ;;  %615 = vperm.xlu0 %1307, %v481_v37   ;;  %v1687_v36 = vld [vmem:[%s2040_s0] ss:$0 sm:$0xff] }
  0x6e   :  { %106 = vperm.xlu1 %1290, %v1427_v12   ;;  %535 = vperm.xlu0 %1307, %v465_v38  }
  0x72   :  { %111 = vperm.xlu1 %1290, %v41_v39   ;;  %605 = vperm.xlu0 %1307, %v479_v40  }
  0x76   :  { %1291 = vset.pattern.permute.xlu1 %v1336_v3  ;;  %525 = vperm.xlu0 %1307, %v463_v41  }
  0x77   :  { %297 = vperm.xlu1 %1291, %v41_v39  }
  0x7a   :  { %595 = vperm.xlu0 %1307, %v477_v42   ;;  %v462_v42 = vld [vmem:[%s2042_s2 + $0x30] sm:$0xff] }
  0x7b   :  { %1292 = vset.pattern.permute.xlu1 %v1337_v8 }
  0x7c   :  { %540 = vperm.xlu1 %1292, %v466_v43  }
  0x7e   :  { %515 = vperm.xlu0 %1307, %v461_v44  }
  0x80   :  { %v1571_v46 = vpop.permute.xlu1 %381  ;;  %176 = vperm.xlu1 %1292, %v1434_v13   ;;  %v1574_v47 = vpop.permute.xlu0 %317  ;;  %v811_v13 = vld [vmem:[%s2044_s4 + $0x18] sm:$0xff] }
  0x82   :  { %585 = vperm.xlu0 %1307, %v475_v45  }
  0x84   :  { %v1582_v50 = vpop.permute.xlu1 %385  ;;  %181 = vperm.xlu1 %1292, %v55_v48   ;;  %v1584_v51 = vpop.permute.xlu0 %309 }
  0x86   :  { %505 = vperm.xlu0 %1307, %v459_v49  }
  0x88   :  { %1293 = vset.pattern.permute.xlu1 %v1336_v3  ;;  %v1590_v53 = vpop.permute.xlu0 %365 }
  0x89   :  { %v1592_v54 = vpop.permute.xlu1 %141  ;;  %353 = vperm.xlu1 %1293, %v55_v48  }
  0x8a   :  { %490 = vperm.xlu0 %1307, %v456_v52  }
  0x8c   :  { %v1600_v57 = vpop.permute.xlu0 %301 }
  0x8d   :  { %1294 = vset.pattern.permute.xlu1 %v1337_v8 }
  0x8e   :  { %v1603_v58 = vpop.permute.xlu1 %321  ;;  %610 = vperm.xlu1 %1294, %v480_v55   ;;  %901 = vperm.xlu0 %1307, %v823_v56  }
  0x90   :  { %v1608_v60 = vpop.permute.xlu0 %357 }
  0x92   :  { %96 = vperm.xlu1 %1294, %v1444_v15   ;;  %891 = vperm.xlu0 %1307, %v821_v59  }
  0x93   :  { %v1611_v61 = vpop.permute.xlu1 %206 }
  0x94   :  { %v1619_v0 = vpop.permute.xlu0 %293 }
  0x96   :  { %101 = vperm.xlu1 %1294, %v39_v62   ;;  %881 = vperm.xlu0 %1307, %v819_v63   ;;  %v51_v63 = vld [vmem:[%s2041_s1 + $0x98] sm:$0xff] }
  0x98   :  { %v1624_v2 = vpop.permute.xlu1 %373  ;;  %v1626_v4 = vpop.permute.xlu0 %349 }
  0x9a   :  { %1295 = vset.pattern.permute.xlu1 %v1336_v3  ;;  %871 = vperm.xlu0 %1307, %v817_v1  }
  0x9b   :  { %289 = vperm.xlu1 %1295, %v39_v62  }
  0x9c   :  { %v1632_v6 = vpop.permute.xlu1 %377  ;;  %v1634_v7 = vpop.permute.xlu0 %285 }
  0x9e   :  { %861 = vperm.xlu0 %1307, %v815_v5  }
  0x9f   :  { %1296 = vset.pattern.permute.xlu1 %v1337_v8 }
  0xa0   :  { %530 = vperm.xlu1 %1296, %v464_v9   ;;  %v1643_v11 = vpop.permute.xlu0 %341 }
  0xa1   :  { %v646_v12 = vpop.permute.xlu1 %645 }
  0xa2   :  { %851 = vperm.xlu0 %1307, %v813_v10  }
  0xa4   :  { %166 = vperm.xlu1 %1296, %v1450_v16   ;;  %v1649_v14 = vpop.permute.xlu0 %277  ;;  %v1034_v16 = vld [vmem:[#allocation2] sm:$0x1] }
  0xa5   :  { %v1651_v15 = vpop.permute.xlu1 %131 }
  0xa6   :  { %841 = vperm.xlu0 %1307, %v811_v13   ;;  %v256_v13 = vmul.f32 %v1687_v36, %v1611_v61 }
  0xa8   :  { %171 = vperm.xlu1 %1296, %v53_v17   ;;  %v1659_v22 = vpop.permute.xlu0 %333 }
  0xaa   :  { %v1661_v25 = vpop.permute.xlu1 %313  ;;  %831 = vperm.xlu0 %1307, %v809_v19  }
  0xac   :  { %1297 = vset.pattern.permute.xlu1 %v1336_v3  ;;  %v1664_v26 = vpop.permute.xlu0 %269 }
  0xad   :  { %345 = vperm.xlu1 %1297, %v53_v17  }
  0xae   :  { %1037 = vperm.xlu0 %1307, %v1034_v16  }
  0xaf   :  { %v561_v27 = vpop.permute.xlu1 %560 }
  0xb0   :  { %v1669_v29 = vpop.permute.xlu0 %325 }
  0xb1   :  { %1298 = vset.pattern.permute.xlu1 %v1337_v8 }
  0xb2   :  { %600 = vperm.xlu1 %1298, %v478_v28  }
  0xb3   :  { %v1672_v30 = vpop.permute.xlu1 %196 }
  0xb4   :  { %v1674_v31 = vpop.permute.xlu0 %261 }
  0xb6   :  { %86 = vperm.xlu1 %1298, %v1460_v18   ;;  %v1694_v18 = vld [vmem:[%s2040_s0 + $0x1] ss:$0 sm:$0xff] }
  0xb7   :  { %v1677_v32 = vpop.permute.xlu1 %201  ;;  %v423_v39 = vmul.f32 %v1694_v18, %v1582_v50  ;;  %v422_v49 = vmul.f32 %v1694_v18, %v1571_v46  ;;  %v406_v50 = vmul.f32 %v1694_v18, %v1574_v47  ;;  %v420_v46 = vmul.f32 %v1694_v18, %v1624_v2 }
  0xb8   :  { %v407_v47 = vmul.f32 %v1694_v18, %v1603_v58  ;;  %v421_v61 = vmul.f32 %v1694_v18, %v1632_v6 }
  0xb9   :  { %v217_v34 = vpop.permute.xlu0 %216  ;;  %v452_v58 = vadd.f32 %v420_v46, %v256_v13 }
  0xba   :  { %91 = vperm.xlu1 %1298, %v37_v33   ;;  %v258_v44 = vmul.f32 %v1687_v36, %v217_v34 }
  0xbc   :  { %v1682_v35 = vpop.permute.xlu1 %369  ;;  %v454_v56 = vadd.f32 %v422_v49, %v258_v44  ;;  %v405_v44 = vmul.f32 %v1694_v18, %v1661_v25  ;;  %v241_v49 = vmul.f32 %v1687_v36, %v1651_v15 }
  0xbd   :  { %v222_v37 = vpop.permute.xlu0 %221  ;;  %v419_v13 = vmul.f32 %v1694_v18, %v1682_v35 }
  0xbe   :  { %v259_v38 = vmul.f32 %v1687_v36, %v222_v37  ;;  %1299 = vset.pattern.permute.xlu1 %v1336_v3 }
  0xbf   :  { %281 = vperm.xlu1 %1299, %v37_v33  }
  0xc0   :  { %v455_v43 = vadd.f32 %v423_v39, %v259_v38 }
  0xc1   :  { %v631_v40 = vpop.permute.xlu1 %630  ;;  %v137_v41 = vpop.permute.xlu0 %136 }
  0xc2   :  { %v679_v52 = vadd.f32 %v646_v12, %v455_v43  ;;  %v242_v55 = vmul.f32 %v1687_v36, %v137_v41  ;;  %v243_v12 = vmul.f32 %v1687_v36, %v1592_v54  ;;  %v676_v38 = vadd.f32 %v631_v40, %v452_v58  ;;  %v476_v43 = vld [vmem:[%s2042_s2 + $0xa0] sm:$0xff] }
  0xc3   :  { %1300 = vset.pattern.permute.xlu1 %v1337_v8  ;;  %v418_v58 = vmul.f32 %v1694_v18, %v1590_v53 }
  0xc4   :  { %520 = vperm.xlu1 %1300, %v462_v42   ;;  %v438_v1 = vadd.f32 %v406_v50, %v242_v55  ;;  %v711_v9 = vmul.f32 0.2, %v679_v52  ;;  %v708_v50 = vmul.f32 0.2, %v676_v38 }
  0xc5   :  { %v1703_v45 = vpop.permute.xlu1 %116  ;;  %v212_v48 = vpop.permute.xlu0 %211 }
  0xc6   :  { %v662_v19 = vadd.f32 %v561_v27, %v438_v1  ;;  %v743_v33 = vmax.f32 %v679_v52, %v711_v9  ;;  %v257_v34 = vmul.f32 %v1687_v36, %v212_v48  ;;  %v740_v46 = vmax.f32 %v676_v38, %v708_v50 }
  0xc8   :  { %156 = vperm.xlu1 %1300, %v1469_v20   ;;  %v404_v20 = vmul.f32 %v1694_v18, %v1584_v51  ;;  %v439_v51 = vadd.f32 %v407_v47, %v243_v12  ;;  %v694_v41 = vmul.f32 0.2, %v662_v19  ;;  %v453_v40 = vadd.f32 %v421_v61, %v257_v34  ;;  %v35_v12 = vld [vmem:[%s2041_s1 + $0x18] sm:$0xff]  ;;  %v460_v61 = vld [vmem:[%s2042_s2 + $0x20] sm:$0xff] }
  0xc9   :  { %v1711_v59 = vpop.permute.xlu1 %121  ;;  %v641_v62 = vpop.permute.xlu0 %640  ;;  %v254_v34 = vmul.f32 %v1687_v36, %v1672_v30 }
  0xca   :  { %v678_v5 = vadd.f32 %v641_v62, %v454_v56  ;;  %v726_v62 = vmax.f32 %v662_v19, %v694_v41 }
  0xcc   :  { %v710_v10 = vmul.f32 0.2, %v678_v5  ;;  %161 = vperm.xlu1 %1300, %v51_v63  }
  0xcd   :  { %v127_v17 = vpop.permute.xlu0 %126 }
  0xce   :  { %v742_v16 = vmax.f32 %v678_v5, %v710_v10  ;;  %v240_v28 = vmul.f32 %v1687_v36, %v127_v17  ;;  %v1727_v2 = vpop.permute.xlu1 %305  ;;  %v437_v5 = vadd.f32 %v405_v44, %v241_v49  ;;  %v239_v49 = vmul.f32 %v1687_v36, %v1711_v59  ;;  %v474_v59 = vld [vmem:[%s2042_s2 + $0x90] sm:$0xff] }
  0xd0   :  { %1301 = vset.pattern.permute.xlu1 %v1336_v3  ;;  %v807_v37 = vpack.c.bf16 %v743_v33, %v742_v16  ;;  %v436_v27 = vadd.f32 %v404_v20, %v240_v28  ;;  %v255_v16 = vmul.f32 %v1687_v36, %v1677_v32  ;;  %v450_v32 = vadd.f32 %v418_v58, %v254_v34 }
  0xd1   :  { %337 = vperm.xlu1 %1301, %v51_v63   ;;  %v566_v54 = vpop.permute.xlu0 %565 }
  0xd2   :  { %v663_v39 = vadd.f32 %v566_v54, %v439_v51  ;;  %1139 = vmatprep.subr.bf16.mxu0 %v807_v37  ;;  %1255 = vmatprep.subr.bf16.mxu1 %v807_v37  ;;  %v451_v51 = vadd.f32 %v419_v13, %v255_v16 }
  0xd3   :  { %v551_v42 = vpop.permute.xlu1 %550 }
  0xd4   :  { %v695_v48 = vmul.f32 0.2, %v663_v39  ;;  %v660_v55 = vadd.f32 %v551_v42, %v436_v27 }
  0xd5   :  { %1302 = vset.pattern.permute.xlu1 %v1337_v8  ;;  %v636_v6 = vpop.permute.xlu0 %635 }
  0xd6   :  { %v727_v52 = vmax.f32 %v663_v39, %v695_v48  ;;  %v677_v56 = vadd.f32 %v636_v6, %v453_v40  ;;  %590 = vperm.xlu1 %1302, %v476_v43   ;;  %v692_v47 = vmul.f32 0.2, %v660_v55  ;;  %v49_v48 = vld [vmem:[%s2041_s1 + $0x88] sm:$0xff]  ;;  %v403_v40 = vmul.f32 %v1694_v18, %v1727_v2 }
  0xd7   :  { %v1741_v63 = vpop.permute.xlu1 %186  ;;  %v402_v6 = vmul.f32 %v1694_v18, %v1600_v57 }
  0xd8   :  { %v709_v1 = vmul.f32 0.2, %v677_v56  ;;  %v799_v9 = vpack.c.bf16 %v727_v52, %v726_v62  ;;  %v724_v28 = vmax.f32 %v660_v55, %v692_v47  ;;  %v435_v52 = vadd.f32 %v403_v40, %v239_v49 }
  0xd9   :  { %v556_v25 = vpop.permute.xlu0 %555 }
  0xda   :  { %v741_v10 = vmax.f32 %v677_v56, %v709_v1  ;;  %v661_v20 = vadd.f32 %v556_v25, %v437_v5  ;;  %76 = vperm.xlu1 %1302, %v1476_v21   ;;  %1140 = vmatpush3.bf16.msra.mxu0 %v799_v9 }
  0xdb   :  { %1263 = vmatpush3.bf16.msra.mxu1 %v799_v9  ;;  %v1744_v15 = vpop.permute.xlu1 %191 }
  0xdc   :  { %v693_v17 = vmul.f32 0.2, %v661_v20  ;;  %v806_v19 = vpack.c.bf16 %v741_v10, %v740_v46 }
  0xdd   :  { %v626_v21 = vpop.permute.xlu0 %625 }
  0xde   :  { %v725_v33 = vmax.f32 %v661_v20, %v693_v17  ;;  %81 = vperm.xlu1 %1302, %v35_v12   ;;  %1141 = vmatprep.subr.bf16.mxu0 %v806_v19  ;;  %v675_v38 = vadd.f32 %v626_v21, %v451_v51  ;;  %v33_v20 = vld [vmem:[%s2041_s1 + $0x8] sm:$0xff] }
  0xdf   :  { %1256 = vmatprep.subr.bf16.mxu1 %v806_v19  ;;  %v416_v19 = vmul.f32 %v1694_v18, %v1608_v60 }
  0xe0   :  { %v362_v37 = vpop.permute.xlu1 %361  ;;  %v798_v35 = vpack.c.bf16 %v725_v33, %v724_v28  ;;  %v707_v27 = vmul.f32 0.2, %v675_v38 }
  0xe1   :  { %v546_v50 = vpop.permute.xlu0 %545  ;;  %v417_v46 = vmul.f32 %v1694_v18, %v362_v37 }
  0xe2   :  { %1303 = vset.pattern.permute.xlu1 %v1336_v3  ;;  %1142 = vmatpush3.bf16.msra.mxu0 %v798_v35  ;;  %v739_v41 = vmax.f32 %v675_v38, %v707_v27  ;;  %v659_v56 = vadd.f32 %v546_v50, %v435_v52 }
  0xe3   :  { %1264 = vmatpush3.bf16.msra.mxu1 %v798_v35  ;;  %273 = vperm.xlu1 %1303, %v35_v12   ;;  %v253_v12 = vmul.f32 %v1687_v36, %v1744_v15  ;;  %v458_v15 = vld [vmem:[%s2042_s2 + $0x10] sm:$0xff] }
  0xe4   :  { %v691_v1 = vmul.f32 0.2, %v659_v56 }
  0xe5   :  { %v621_v54 = vpop.permute.xlu1 %620  ;;  %v449_v13 = vadd.f32 %v417_v46, %v253_v12  ;;  %v616_v17 = vpop.permute.xlu0 %615 }
  0xe6   :  { %v674_v53 = vadd.f32 %v621_v54, %v450_v32 }
  0xe7   :  { %1304 = vset.pattern.permute.xlu1 %v1337_v8  ;;  %v673_v28 = vadd.f32 %v616_v17, %v449_v13  ;;  %v414_v13 = vmul.f32 %v1694_v18, %v1626_v4 }
  0xe8   :  { %v706_v30 = vmul.f32 0.2, %v674_v53  ;;  %510 = vperm.xlu1 %1304, %v460_v61  }
  0xe9   :  { %v1762_v39 = vpop.permute.xlu1 %106  ;;  %v705_v58 = vmul.f32 0.2, %v673_v28  ;;  %v536_v27 = vpop.permute.xlu0 %535 }
  0xea   :  { %v738_v42 = vmax.f32 %v674_v53, %v706_v30  ;;  %v457_v53 = vld [vmem:[%s2042_s2 + $0x8] sm:$0xff]  ;;  %v400_v30 = vmul.f32 %v1694_v18, %v1619_v0  ;;  %v747_v0 = vld [vmem:[%s2043_s3 + $0x18] sm:$0xff] }
  0xec   :  { %146 = vperm.xlu1 %1304, %v1485_v23   ;;  %v805_v43 = vpack.c.bf16 %v739_v41, %v738_v42  ;;  %v238_v23 = vmul.f32 %v1687_v36, %v1703_v45  ;;  %v723_v45 = vmax.f32 %v659_v56, %v691_v1  ;;  %v236_v41 = vmul.f32 %v1687_v36, %v1762_v39  ;;  %v761_v39 = vld [vmem:[%s2043_s3 + $0x88] sm:$0xff] }
  0xed   :  { %v112_v44 = vpop.permute.xlu1 %111  ;;  %v606_v12 = vpop.permute.xlu0 %605 }
  0xee   :  { %1143 = vmatprep.subr.bf16.mxu0 %v805_v43  ;;  %1257 = vmatprep.subr.bf16.mxu1 %v805_v43  ;;  %v434_v2 = vadd.f32 %v402_v6, %v238_v23  ;;  %v237_v54 = vmul.f32 %v1687_v36, %v112_v44  ;;  %v822_v44 = vld [vmem:[%s2044_s4 + $0x70] sm:$0xff]  ;;  %v745_v6 = vld [vmem:[%s2043_s3 + $0x8] sm:$0xff]  ;;  %v820_v23 = vld [vmem:[%s2044_s4 + $0x60] sm:$0xff] }
  0xef   :  { %v777_v52 = vpack.c.bf16 %v747_v0, %v745_v6 }
  0xf0   :  { %151 = vperm.xlu1 %1304, %v49_v48  }
  0xf1   :  { %936 = vmatprep.mubr.bf16.mxu0 %v777_v52 }
  0xf2   :  { %v298_v55 = vpop.permute.xlu1 %297 }
  0xf3   :  { %v401_v35 = vmul.f32 %v1694_v18, %v298_v55  ;;  %v763_v55 = vld [vmem:[%s2043_s3 + $0x98] sm:$0xff] }
  0xf4   :  { %1305 = vset.pattern.permute.xlu1 %v1336_v3 }
  0xf5   :  { %329 = vperm.xlu1 %1305, %v49_v48   ;;  %v433_v61 = vadd.f32 %v401_v35, %v237_v54  ;;  %v432_v48 = vadd.f32 %v400_v30, %v236_v41  ;;  %v808_v35 = vld [vmem:[%s2044_s4] sm:$0xff]  ;;  %v398_v54 = vmul.f32 %v1694_v18, %v1634_v7 }
  0xf7   :  { %v541_v62 = vpop.permute.xlu1 %540  ;;  %v657_v43 = vadd.f32 %v536_v27, %v433_v61 }
  0xf8   :  { %v658_v5 = vadd.f32 %v541_v62, %v434_v2  ;;  %v785_v2 = vpack.c.bf16 %v763_v55, %v761_v39  ;;  %v412_v55 = vmul.f32 %v1694_v18, %v1643_v11 }
  0xf9   :  { %1306 = vset.pattern.permute.xlu1 %v1337_v8  ;;  %v689_v49 = vmul.f32 0.2, %v657_v43 }
  0xfa   :  { %v690_v57 = vmul.f32 0.2, %v658_v5  ;;  %580 = vperm.xlu1 %1306, %v474_v59   ;;  %968 = vmatprep.mubr.bf16.mxu1 %v785_v2 }
  0xfb   :  { %v1781_v9 = vpop.permute.xlu1 %176  ;;  %v721_v59 = vmax.f32 %v657_v43, %v689_v49 }
  0xfc   :  { %v722_v25 = vmax.f32 %v658_v5, %v690_v57  ;;  %v818_v5 = vld [vmem:[%s2044_s4 + $0x50] sm:$0xff]  ;;  %v250_v17 = vmul.f32 %v1687_v36, %v1781_v9 }
  0xfd   :  { %v810_v9 = vld [vmem:[%s2044_s4 + $0x10] sm:$0xff] }
  0xfe   :  { %66 = vperm.xlu1 %1306, %v1492_v24   ;;  %v797_v47 = vpack.c.bf16 %v723_v45, %v722_v25  ;;  %v252_v24 = vmul.f32 %v1687_v36, %v1741_v63  ;;  %v472_v63 = vld [vmem:[%s2042_s2 + $0x80] sm:$0xff] }
  0xff   :  { %v1785_v10 = vpop.permute.xlu1 %181 }
 0x100   :  { %1144 = vmatpush3.bf16.msra.mxu0 %v797_v47  ;;  %1265 = vmatpush3.bf16.msra.mxu1 %v797_v47  ;;  %v448_v33 = vadd.f32 %v416_v19, %v252_v24  ;;  %v251_v46 = vmul.f32 %v1687_v36, %v1785_v10  ;;  %v816_v47 = vld [vmem:[%s2044_s4 + $0x40] sm:$0xff]  ;;  %v814_v10 = vld [vmem:[%s2044_s4 + $0x30] sm:$0xff] }
 0x102   :  { %71 = vperm.xlu1 %1306, %v33_v20  }
 0x104   :  { %v354_v16 = vpop.permute.xlu1 %353 }
 0x105   :  { %v415_v57 = vmul.f32 %v1694_v18, %v354_v16  ;;  %v446_v16 = vadd.f32 %v414_v13, %v250_v17 }
 0x106   :  { %1308 = vset.pattern.permute.xlu1 %v1336_v3  ;;  %v737_v3 = vmax.f32 %v673_v28, %v705_v58 }
 0x107   :  { %265 = vperm.xlu1 %1308, %v33_v20   ;;  %v447_v20 = vadd.f32 %v415_v57, %v251_v46 }
 0x109   :  { %v611_v21 = vpop.permute.xlu1 %610  ;;  %v671_v24 = vadd.f32 %v606_v12, %v447_v20 }
 0x10a   :  { %v672_v34 = vadd.f32 %v611_v21, %v448_v33  ;;  %v812_v33 = vld [vmem:[%s2044_s4 + $0x20] sm:$0xff] }
 0x10b   :  { %1309 = vset.pattern.permute.xlu1 %v1337_v8  ;;  %v473_v8 = vld [vmem:[%s2042_s2 + $0x88] sm:$0xff]  ;;  %v703_v21 = vmul.f32 0.2, %v671_v24 }
 0x10c   :  { %v704_v51 = vmul.f32 0.2, %v672_v34  ;;  %500 = vperm.xlu1 %1309, %v458_v15  }
 0x10d   :  { %v1801_v60 = vpop.permute.xlu1 %96 }
 0x10e   :  { %v736_v37 = vmax.f32 %v672_v34, %v704_v51  ;;  %v735_v34 = vmax.f32 %v671_v24, %v703_v21  ;;  %v234_v61 = vmul.f32 %v1687_v36, %v1801_v60 }
 0x110   :  { %570 = vperm.xlu1 %1309, %v472_v63   ;;  %v804_v38 = vpack.c.bf16 %v737_v3, %v736_v37  ;;  %v430_v41 = vadd.f32 %v398_v54, %v234_v61 }
 0x111   :  { %v1807_v32 = vpop.permute.xlu1 %101 }
 0x112   :  { %1145 = vmatprep.subr.bf16.mxu0 %v804_v38  ;;  %1258 = vmatprep.subr.bf16.mxu1 %v804_v38  ;;  %v235_v38 = vmul.f32 %v1687_v36, %v1807_v32 }
 0x114   :  { %575 = vperm.xlu1 %1309, %v473_v8  }
 0x116   :  { %v290_v42 = vpop.permute.xlu1 %289 }
 0x117   :  { %v399_v63 = vmul.f32 %v1694_v18, %v290_v42 }
 0x118   :  { %495 = vperm.xlu1 %1309, %v457_v53   ;;  %v526_v53 = vpop.permute.xlu0 %525 }
 0x119   :  { %v431_v8 = vadd.f32 %v399_v63, %v235_v38 }
 0x11b   :  { %v531_v40 = vpop.permute.xlu1 %530  ;;  %v655_v30 = vadd.f32 %v526_v53, %v431_v8  ;;  %v410_v8 = vmul.f32 %v1694_v18, %v1659_v22 }
 0x11c   :  { %v656_v50 = vadd.f32 %v531_v40, %v432_v48  ;;  %896 = vperm.xlu1 %1309, %v822_v44   ;;  %v596_v52 = vpop.permute.xlu0 %595 }
 0x11d   :  { %v687_v43 = vmul.f32 0.2, %v655_v30 }
 0x11e   :  { %v688_v56 = vmul.f32 0.2, %v656_v50 }
 0x11f   :  { %v1838_v62 = vpop.permute.xlu1 %166  ;;  %v719_v49 = vmax.f32 %v655_v30, %v687_v43 }
 0x120   :  { %v720_v1 = vmax.f32 %v656_v50, %v688_v56  ;;  %886 = vperm.xlu1 %1309, %v820_v23   ;;  %v248_v39 = vmul.f32 %v1687_v36, %v1838_v62 }
 0x122   :  { %v796_v45 = vpack.c.bf16 %v721_v59, %v720_v1  ;;  %v444_v2 = vadd.f32 %v412_v55, %v248_v39 }
 0x123   :  { %v172_v25 = vpop.permute.xlu1 %171 }
 0x124   :  { %876 = vperm.xlu1 %1309, %v818_v5   ;;  %1146 = vmatpush3.bf16.msra.mxu0 %v796_v45  ;;  %v249_v7 = vmul.f32 %v1687_v36, %v172_v25 }
 0x125   :  { %1266 = vmatpush3.bf16.msra.mxu1 %v796_v45 }
 0x128   :  { %v346_v19 = vpop.permute.xlu1 %345  ;;  %866 = vperm.xlu1 %1309, %v816_v47  }
 0x129   :  { %v413_v50 = vmul.f32 %v1694_v18, %v346_v19  ;;  %v516_v19 = vpop.permute.xlu0 %515 }
 0x12b   :  { %v445_v60 = vadd.f32 %v413_v50, %v249_v7 }
 0x12c   :  { %856 = vperm.xlu1 %1309, %v814_v10   ;;  %v396_v10 = vmul.f32 %v1694_v18, %v1649_v14 }
 0x12d   :  { %v601_v28 = vpop.permute.xlu1 %600  ;;  %v669_v56 = vadd.f32 %v596_v52, %v445_v60  ;;  %v586_v38 = vpop.permute.xlu0 %585  ;;  %v394_v60 = vmul.f32 %v1694_v18, %v1664_v26 }
 0x12e   :  { %v670_v15 = vadd.f32 %v601_v28, %v446_v16 }
 0x12f   :  { %v701_v1 = vmul.f32 0.2, %v669_v56 }
 0x130   :  { %v702_v4 = vmul.f32 0.2, %v670_v15  ;;  %846 = vperm.xlu1 %1309, %v812_v33  }
 0x131   :  { %v87_v58 = vpop.permute.xlu1 %86  ;;  %v733_v25 = vmax.f32 %v669_v56, %v701_v1  ;;  %v408_v56 = vmul.f32 %v1694_v18, %v1669_v29  ;;  %v392_v1 = vmul.f32 %v1694_v18, %v1674_v31 }
 0x132   :  { %v734_v51 = vmax.f32 %v670_v15, %v702_v4  ;;  %v232_v11 = vmul.f32 %v1687_v36, %v87_v58 }
 0x134   :  { %836 = vperm.xlu1 %1309, %v810_v9   ;;  %v803_v3 = vpack.c.bf16 %v735_v34, %v734_v51  ;;  %v428_v16 = vadd.f32 %v396_v10, %v232_v11 }
 0x135   :  { %v92_v37 = vpop.permute.xlu1 %91 }
 0x136   :  { %1147 = vmatprep.subr.bf16.mxu0 %v803_v3  ;;  %1259 = vmatprep.subr.bf16.mxu1 %v803_v3  ;;  %v233_v62 = vmul.f32 %v1687_v36, %v92_v37 }
 0x138   :  { %826 = vperm.xlu1 %1309, %v808_v35  }
 0x13a   :  { %v282_v27 = vpop.permute.xlu1 %281 }
 0x13b   :  { %v397_v47 = vmul.f32 %v1694_v18, %v282_v27 }
 0x13d   :  { %v429_v13 = vadd.f32 %v397_v47, %v233_v62 }
 0x13f   :  { %v521_v42 = vpop.permute.xlu1 %520  ;;  %v653_v24 = vadd.f32 %v516_v19, %v429_v13 }
 0x140   :  { %v654_v44 = vadd.f32 %v521_v42, %v430_v41 }
 0x141   :  { %v685_v33 = vmul.f32 0.2, %v653_v24 }
 0x142   :  { %v686_v48 = vmul.f32 0.2, %v654_v44 }
 0x143   :  { %v157_v40 = vpop.permute.xlu1 %156  ;;  %v717_v34 = vmax.f32 %v653_v24, %v685_v33 }
 0x144   :  { %v718_v32 = vmax.f32 %v654_v44, %v686_v48  ;;  %v246_v14 = vmul.f32 %v1687_v36, %v157_v40 }
 0x146   :  { %v795_v6 = vpack.c.bf16 %v719_v49, %v718_v32  ;;  %v442_v61 = vadd.f32 %v410_v8, %v246_v14  ;;  %v749_v14 = vld [vmem:[%s2043_s3 + $0x28] sm:$0xff]  ;;  %v767_v8 = vld [vmem:[%s2043_s3 + $0xb8] sm:$0xff] }
 0x147   :  { %v162_v0 = vpop.permute.xlu1 %161 }
 0x148   :  { %1148 = vmatpush3.bf16.msra.mxu0 %v795_v6  ;;  %1267 = vmatpush3.bf16.msra.mxu1 %v795_v6  ;;  %v247_v58 = vmul.f32 %v1687_v36, %v162_v0  ;;  %v506_v6 = vpop.permute.xlu0 %505 }
 0x14c   :  { %v338_v23 = vpop.permute.xlu1 %337  ;;  %v491_v11 = vpop.permute.xlu0 %490 }
 0x14d   :  { %v411_v51 = vmul.f32 %v1694_v18, %v338_v23 }
 0x14f   :  { %v443_v37 = vadd.f32 %v411_v51, %v247_v58  ;;  %v744_v51 = vld [vmem:[%s2043_s3] sm:$0xff] }
 0x150   :  { %v760_v58 = vld [vmem:[%s2043_s3 + $0x80] sm:$0xff] }
 0x151   :  { %v591_v59 = vpop.permute.xlu1 %590  ;;  %v667_v54 = vadd.f32 %v586_v38, %v443_v37  ;;  %v762_v37 = vld [vmem:[%s2043_s3 + $0x90] sm:$0xff]  ;;  %v765_v38 = vld [vmem:[%s2043_s3 + $0xa8] sm:$0xff] }
 0x152   :  { %v668_v5 = vadd.f32 %v591_v59, %v444_v2 }
 0x153   :  { %v699_v53 = vmul.f32 0.2, %v667_v54 }
 0x154   :  { %v700_v57 = vmul.f32 0.2, %v668_v5 }
 0x155   :  { %v77_v45 = vpop.permute.xlu1 %76  ;;  %v731_v44 = vmax.f32 %v667_v54, %v699_v53 }
 0x156   :  { %v732_v46 = vmax.f32 %v668_v5, %v700_v57  ;;  %v230_v22 = vmul.f32 %v1687_v36, %v77_v45 }
 0x158   :  { %v802_v20 = vpack.c.bf16 %v733_v25, %v732_v46  ;;  %v426_v23 = vadd.f32 %v394_v60, %v230_v22  ;;  %v754_v60 = vld [vmem:[%s2043_s3 + $0x50] sm:$0xff] }
 0x159   :  { %v82_v12 = vpop.permute.xlu1 %81 }
 0x15a   :  { %1149 = vmatprep.subr.bf16.mxu0 %v802_v20  ;;  %1260 = vmatprep.subr.bf16.mxu1 %v802_v20  ;;  %v231_v49 = vmul.f32 %v1687_v36, %v82_v12 }
 0x15e   :  { %v274_v17 = vpop.permute.xlu1 %273 }
 0x15f   :  { %v395_v48 = vmul.f32 %v1694_v18, %v274_v17 }
 0x161   :  { %v427_v50 = vadd.f32 %v395_v48, %v231_v49  ;;  %v753_v48 = vld [vmem:[%s2043_s3 + $0x48] sm:$0xff] }
 0x162   :  { %v769_v49 = vld [vmem:[%s2043_s3 + $0xc8] sm:$0xff] }
 0x163   :  { %v511_v28 = vpop.permute.xlu1 %510  ;;  %v651_v7 = vadd.f32 %v506_v6, %v427_v50 }
 0x164   :  { %v652_v21 = vadd.f32 %v511_v28, %v428_v16 }
 0x165   :  { %v683_v52 = vmul.f32 0.2, %v651_v7 }
 0x166   :  { %v684_v15 = vmul.f32 0.2, %v652_v21 }
 0x167   :  { %v147_v4 = vpop.permute.xlu1 %146  ;;  %v715_v26 = vmax.f32 %v651_v7, %v683_v52  ;;  %v752_v7 = vld [vmem:[%s2043_s3 + $0x40] sm:$0xff]  ;;  %v757_v52 = vld [vmem:[%s2043_s3 + $0x68] sm:$0xff] }
 0x168   :  { %v716_v9 = vmax.f32 %v652_v21, %v684_v15  ;;  %v244_v39 = vmul.f32 %v1687_v36, %v147_v4 }
 0x16a   :  { %v794_v63 = vpack.c.bf16 %v717_v34, %v716_v9  ;;  %v440_v45 = vadd.f32 %v408_v56, %v244_v39  ;;  %v768_v39 = vld [vmem:[%s2043_s3 + $0xc0] sm:$0xff]  ;;  %v773_v56 = vld [vmem:[%s2043_s3 + $0xe8] sm:$0xff] }
 0x16b   :  { %v152_v3 = vpop.permute.xlu1 %151 }
 0x16c   :  { %1150 = vmatpush3.bf16.msra.mxu0 %v794_v63  ;;  %1268 = vmatpush3.bf16.msra.mxu1 %v794_v63  ;;  %v245_v25 = vmul.f32 %v1687_v36, %v152_v3 }
 0x170   :  { %v330_v35 = vpop.permute.xlu1 %329 }
 0x171   :  { %v409_v5 = vmul.f32 %v1694_v18, %v330_v35  ;;  %v751_v35 = vld [vmem:[%s2043_s3 + $0x38] sm:$0xff] }
 0x172   :  { %v779_v53 = vpack.c.bf16 %v751_v35, %v749_v14 }
 0x173   :  { %v441_v29 = vadd.f32 %v409_v5, %v245_v25  ;;  %v774_v25 = vld [vmem:[%s2043_s3 + $0xf0] sm:$0xff] }
 0x175   :  { %v581_v27 = vpop.permute.xlu1 %580 }
 0x176   :  { %v666_v30 = vadd.f32 %v581_v27, %v442_v61  ;;  %v784_v27 = vpack.c.bf16 %v762_v37, %v760_v58 }
 0x178   :  { %v698_v41 = vmul.f32 0.2, %v666_v30 }
 0x179   :  { %v67_v42 = vpop.permute.xlu1 %66 }
 0x17a   :  { %v730_v43 = vmax.f32 %v666_v30, %v698_v41  ;;  %v228_v2 = vmul.f32 %v1687_v36, %v67_v42  ;;  %v787_v30 = vpack.c.bf16 %v767_v8, %v765_v38  ;;  %v748_v41 = vld [vmem:[%s2043_s3 + $0x20] sm:$0xff]  ;;  %v750_v42 = vld [vmem:[%s2043_s3 + $0x30] sm:$0xff] }
 0x17b   :  { %v778_v50 = vpack.c.bf16 %v750_v42, %v748_v41 }
 0x17c   :  { %v801_v32 = vpack.c.bf16 %v731_v44, %v730_v43  ;;  %v424_v47 = vadd.f32 %v392_v1, %v228_v2  ;;  %v764_v43 = vld [vmem:[%s2043_s3 + $0xa0] sm:$0xff]  ;;  %v766_v44 = vld [vmem:[%s2043_s3 + $0xb0] sm:$0xff]  ;;  %v775_v2 = vld [vmem:[%s2043_s3 + $0xf8] sm:$0xff] }
 0x17d   :  { %v72_v40 = vpop.permute.xlu1 %71  ;;  %v786_v6 = vpack.c.bf16 %v766_v44, %v764_v43 }
 0x17e   :  { %1151 = vmatprep.subr.bf16.mxu0 %v801_v32  ;;  %1261 = vmatprep.subr.bf16.mxu1 %v801_v32  ;;  %v648_v19 = vadd.f32 %v491_v11, %v424_v47  ;;  %v229_v31 = vmul.f32 %v1687_v36, %v72_v40  ;;  %v746_v36 = vld [vmem:[%s2043_s3 + $0x10] sm:$0xff]  ;;  %v755_v32 = vld [vmem:[%s2043_s3 + $0x58] sm:$0xff] }
 0x17f   :  { %v776_v61 = vpack.c.bf16 %v746_v36, %v744_v51  ;;  %v771_v40 = vld [vmem:[%s2043_s3 + $0xd8] sm:$0xff]  ;;  %v781_v22 = vpack.c.bf16 %v755_v32, %v753_v48 }
 0x180   :  { %v680_v21 = vmul.f32 0.2, %v648_v19 }
 0x182   :  { %v266_v0 = vpop.permute.xlu1 %265  ;;  %v712_v3 = vmax.f32 %v648_v19, %v680_v21 }
 0x183   :  { %v393_v62 = vmul.f32 %v1694_v18, %v266_v0  ;;  %v789_v0 = vpack.c.bf16 %v771_v40, %v769_v49 }
 0x185   :  { %v425_v28 = vadd.f32 %v393_v62, %v229_v31 }
 0x187   :  { %v501_v55 = vpop.permute.xlu1 %500 }
 0x188   :  { %v650_v59 = vadd.f32 %v501_v55, %v426_v23  ;;  %v770_v23 = vld [vmem:[%s2043_s3 + $0xd0] sm:$0xff]  ;;  %v759_v55 = vld [vmem:[%s2043_s3 + $0x78] sm:$0xff] }
 0x189   :  { %v788_v1 = vpack.c.bf16 %v770_v23, %v768_v39  ;;  %v783_v5 = vpack.c.bf16 %v759_v55, %v757_v52 }
 0x18a   :  { %v682_v57 = vmul.f32 0.2, %v650_v59 }
 0x18b   :  { %v571_v46 = vpop.permute.xlu1 %570 }
 0x18c   :  { %v714_v20 = vmax.f32 %v650_v59, %v682_v57  ;;  %v664_v12 = vadd.f32 %v571_v46, %v440_v45  ;;  %v780_v59 = vpack.c.bf16 %v754_v60, %v752_v7  ;;  %v791_v57 = vpack.c.bf16 %v775_v2, %v773_v56  ;;  %v756_v45 = vld [vmem:[%s2043_s3 + $0x60] sm:$0xff]  ;;  %v758_v46 = vld [vmem:[%s2043_s3 + $0x70] sm:$0xff] }
 0x18d   :  { %v782_v47 = vpack.c.bf16 %v758_v46, %v756_v45 }
 0x18e   :  { %v793_v13 = vpack.c.bf16 %v715_v26, %v714_v20  ;;  %v696_v10 = vmul.f32 0.2, %v664_v12  ;;  %v772_v26 = vld [vmem:[%s2043_s3 + $0xe0] sm:$0xff] }
 0x18f   :  { %v576_v17 = vpop.permute.xlu1 %575  ;;  %v790_v20 = vpack.c.bf16 %v774_v25, %v772_v26 }
 0x190   :  { %v665_v24 = vadd.f32 %v576_v17, %v441_v29  ;;  %1152 = vmatpush3.bf16.msra.mxu0 %v793_v13  ;;  %1269 = vmatpush3.bf16.msra.mxu1 %v793_v13  ;;  %v728_v15 = vmax.f32 %v664_v12, %v696_v10  ;;  %v1338_v12 = vmov 0.0  }
 0x192   :  { %v697_v16 = vmul.f32 0.2, %v665_v24 }
 0x193   :  { %v496_v33 = vpop.permute.xlu1 %495 }
 0x194   :  { %v729_v4 = vmax.f32 %v665_v24, %v697_v16  ;;  %v649_v9 = vadd.f32 %v496_v33, %v425_v28 }
 0x196   :  { %v681_v34 = vmul.f32 0.2, %v649_v9  ;;  %v800_v18 = vpack.c.bf16 %v729_v4, %v728_v15  ;;  %v902_v4 = vpop.permute.xlu0 %901 }
 0x198   :  { %v713_v63 = vmax.f32 %v649_v9, %v681_v34  ;;  %1153 = vmatprep.subr.bf16.mxu0 %v800_v18  ;;  %1262 = vmatprep.subr.bf16.mxu1 %v800_v18  ;;  %v897_v18 = vpop.permute.xlu1 %896 }
 0x19a   :  { %v792_v54 = vpack.c.bf16 %v713_v63, %v712_v3  ;;  %v892_v58 = vpop.permute.xlu0 %891 }
 0x19c   :  { %1154 = vmatpush3.bf16.msra.mxu0 %v792_v54  ;;  %1270 = vmatpush3.bf16.msra.mxu1 %v792_v54  ;;  %v887_v35 = vpop.permute.xlu1 %886 }
 0x19d   :  { %1220 = vmatprep.subr.mxu1 %v1338_v12 }
 0x19f   :  { %937 = vmatmul.mubr.bf16.vlgmr.msra.gmra.mxu0 %v776_v61  ;;  %969 = vmatmul.mubr.bf16.vlgmr.msra.gmra.mxu1 %v784_v27  ;;  %v882_v61 = vpop.permute.xlu0 %881 }
 0x1a0   :  { %944 = vmatprep.mubr.bf16.mxu0 %v779_v53  ;;  %976 = vmatprep.mubr.bf16.mxu1 %v787_v30  ;;  %v877_v41 = vpop.permute.xlu1 %876 }
 0x1a4   :  { %v867_v7 = vpop.permute.xlu1 %866 }
 0x1a7   :  { %945 = vmatmul.mubr.bf16.gmra.mxu0 %v778_v50  ;;  %977 = vmatmul.mubr.bf16.gmra.mxu1 %v786_v6  ;;  %v872_v50 = vpop.permute.xlu0 %871 }
 0x1a8   :  { %952 = vmatprep.mubr.bf16.mxu0 %v781_v22  ;;  %984 = vmatprep.mubr.bf16.mxu1 %v789_v0 }
 0x1af   :  { %953 = vmatmul.mubr.bf16.gmra.mxu0 %v780_v59  ;;  %985 = vmatmul.mubr.bf16.gmra.mxu1 %v788_v1 }
 0x1b0   :  { %960 = vmatprep.mubr.bf16.mxu0 %v783_v5  ;;  %992 = vmatprep.mubr.bf16.mxu1 %v791_v57  ;;  %v862_v5 = vpop.permute.xlu0 %861 }
 0x1b7   :  { %961 = vmatmul.mubr.bf16.gmra.mxu0 %v782_v47  ;;  %993 = vmatmul.mubr.bf16.gmra.mxu1 %v790_v20  ;;  %v857_v47 = vpop.permute.xlu1 %856 }
 0x1b8   :  { %1252 = vmatprep.mubr.msk.f32.mxu1 %vm1339_vm0, %v1338_v12 }
 0x25f   :  { %v1989_v62 = vpop.f32.mrf.mxu0  ;;  %v1179_v29 = vpop.f32.mrf.mxu1 }
 0x261   :  { %v1991_v13 = vpop.f32.mrf.mxu0  ;;  %v1180_v11 = vpop.f32.mrf.mxu1 }
 0x262   :  { %v1181_v45 = vadd.f32 %v1180_v11, %v1179_v29  ;;  %v852_v29 = vpop.permute.xlu0 %851 }
 0x263   :  { %v1993_v17 = vpop.f32.mrf.mxu0  ;;  %v1182_v19 = vpop.f32.mrf.mxu1 }
 0x265   :  { %v1995_v31 = vpop.f32.mrf.mxu0  ;;  %v1183_v10 = vpop.f32.mrf.mxu1 }
 0x266   :  { %v1184_v56 = vadd.f32 %v1183_v10, %v1182_v19  ;;  %v971_v19 = vadd.f32 %v1181_v45, %v867_v7 }
 0x267   :  { %v1997_v24 = vpop.f32.mrf.mxu0  ;;  %v1185_v16 = vpop.f32.mrf.mxu1 }
 0x268   :  { %v974_v20 = vadd.f32 %v1184_v56, %v872_v50 }
 0x269   :  { %v1999_v28 = vpop.f32.mrf.mxu0  ;;  %v1186_v33 = vpop.f32.mrf.mxu1 }
 0x26a   :  { %v1187_v39 = vadd.f32 %v1186_v33, %v1185_v16  ;;  %v1010_v11 = vmul.f32 0.2, %v974_v20 }
 0x26b   :  { %v2001_v21 = vpop.f32.mrf.mxu0  ;;  %v1188_v15 = vpop.f32.mrf.mxu1 }
 0x26c   :  { %v979_v46 = vadd.f32 %v1187_v39, %v877_v41  ;;  %v1163_v41 = vadd.f32 %v1999_v28, %v1997_v24 }
 0x26d   :  { %v2003_v9 = vpop.f32.mrf.mxu0  ;;  %v1189_v34 = vpop.f32.mrf.mxu1 }
 0x26e   :  { %v1190_v6 = vadd.f32 %v1189_v34, %v1188_v15  ;;  %v1011_v10 = vmul.f32 0.2, %v979_v46 }
 0x26f   :  { %v2005_v51 = vpop.f32.mrf.mxu0  ;;  %v1191_v36 = vpop.f32.mrf.mxu1 }
 0x270   :  { %v982_v2 = vadd.f32 %v1190_v6, %v882_v61  ;;  %v1026_v61 = vmax.f32 %v974_v20, %v1010_v11 }
 0x271   :  { %v2007_v63 = vpop.f32.mrf.mxu0  ;;  %v1192_v3 = vpop.f32.mrf.mxu1 }
 0x272   :  { %v1193_v32 = vadd.f32 %v1192_v3, %v1191_v36  ;;  %v1012_v15 = vmul.f32 0.2, %v982_v2 }
 0x273   :  { %v1170_v37 = vpop.f32.mrf.mxu0  ;;  %v1194_v14 = vpop.f32.mrf.mxu1 }
 0x274   :  { %v987_v23 = vadd.f32 %v1193_v32, %v887_v35  ;;  %v1027_v35 = vmax.f32 %v979_v46, %v1011_v10 }
 0x275   :  { %v1171_v38 = vpop.f32.mrf.mxu0  ;;  %v1195_v8 = vpop.f32.mrf.mxu1 }
 0x276   :  { %v1196_v43 = vadd.f32 %v1195_v8, %v1194_v14  ;;  %v1013_v26 = vmul.f32 0.2, %v987_v23  ;;  %v1172_v36 = vadd.f32 %v1171_v38, %v1170_v37  ;;  %v1009_v14 = vmul.f32 0.2, %v971_v19  ;;  %v842_v38 = vpop.permute.xlu0 %841 }
 0x277   :  { %v1197_v54 = vpop.f32.mrf.mxu1  ;;  %v1173_v27 = vpop.f32.mrf.mxu0  ;;  %v1169_v8 = vadd.f32 %v2007_v63, %v2005_v51 }
 0x278   :  { %v990_v22 = vadd.f32 %v1196_v43, %v892_v58  ;;  %v847_v58 = vpop.permute.xlu1 %846  ;;  %v1160_v43 = vadd.f32 %v1995_v31, %v1993_v17 }
 0x279   :  { %v1198_v53 = vpop.f32.mrf.mxu1  ;;  %v1174_v44 = vpop.f32.mrf.mxu0 }
 0x27a   :  { %v1199_v30 = vadd.f32 %v1198_v53, %v1197_v54  ;;  %v1014_v59 = vmul.f32 0.2, %v990_v22  ;;  %v1175_v34 = vadd.f32 %v1174_v44, %v1173_v27  ;;  %v1166_v27 = vadd.f32 %v2003_v9, %v2001_v21 }
 0x27b   :  { %v1200_v42 = vpop.f32.mrf.mxu1  ;;  %v1176_v60 = vpop.f32.mrf.mxu0  ;;  %v958_v53 = vadd.f32 %v1172_v36, %v852_v29 }
 0x27c   :  { %v995_v49 = vadd.f32 %v1199_v30, %v897_v18  ;;  %v1030_v16 = vmax.f32 %v990_v22, %v1014_v59  ;;  %v1028_v18 = vmax.f32 %v982_v2, %v1012_v15  ;;  %v963_v54 = vadd.f32 %v1175_v34, %v857_v47  ;;  %v837_v63 = vpop.permute.xlu1 %836 }
 0x27d   :  { %v1201_v48 = vpop.f32.mrf.mxu1  ;;  %v1177_v57 = vpop.f32.mrf.mxu0  ;;  %v1025_v30 = vmax.f32 %v971_v19, %v1009_v14  ;;  %v950_v21 = vadd.f32 %v1166_v27, %v842_v38  ;;  %v1006_v9 = vmul.f32 0.2, %v958_v53  ;;  %v947_v32 = vadd.f32 %v1163_v41, %v837_v63 }
 0x27e   :  { %v1202_v40 = vadd.f32 %v1201_v48, %v1200_v42  ;;  %v1015_v52 = vmul.f32 0.2, %v995_v49  ;;  %v1178_v33 = vadd.f32 %v1177_v57, %v1176_v60  ;;  %v955_v42 = vadd.f32 %v1169_v8, %v847_v58 }
 0x27f   :  { %v1007_v51 = vmul.f32 0.2, %v963_v54  ;;  %v1157_v48 = vadd.f32 %v1991_v13, %v1989_v62  ;;  %v1004_v50 = vmul.f32 0.2, %v950_v21  ;;  %v1022_v6 = vmax.f32 %v958_v53, %v1006_v9 }
 0x280   :  { %v998_v0 = vadd.f32 %v1202_v40, %v902_v4  ;;  %v1031_v25 = vmax.f32 %v995_v49, %v1015_v52  ;;  %v1029_v4 = vmax.f32 %v987_v23, %v1013_v26  ;;  %v966_v3 = vadd.f32 %v1178_v33, %v862_v5  ;;  %v832_v49 = vpop.permute.xlu0 %831  ;;  %v827_v17 = vpop.permute.xlu1 %826  ;;  %v1033_v52 = vld [vmem:[%s2045_s5] sm:$0x1]  ;;  %s1340_s5 = smov [#allocation3]  }
 0x281   :  { %v1005_v24 = vmul.f32 0.2, %v955_v42  ;;  %v1023_v28 = vmax.f32 %v963_v54, %v1007_v51  ;;  %v942_v40 = vadd.f32 %v1160_v43, %v832_v49  ;;  %v939_v31 = vadd.f32 %v1157_v48, %v827_v17  ;;  %s1128_s25 = sshll.u32 %s1340_s5, 4  ;;  %s1129_s25 = int_to_ptr.vmem [resolvable:$true] %s1128_s25 }
 0x282   :  { %v1016_v55 = vmul.f32 0.2, %v998_v0  ;;  %v1008_v37 = vmul.f32 0.2, %v966_v3  ;;  %v1003_v22 = vmul.f32 0.2, %v947_v32  ;;  %v1020_v13 = vmax.f32 %v950_v21, %v1004_v50  ;;  %p1319_p1 = scmp.lt.s32.totalorder %s1129_s25, %s1129_s25 }
 0x283   :  { %v1002_v62 = vmul.f32 0.2, %v942_v40  ;;  %v1001_v7 = vmul.f32 0.2, %v939_v31  ;;  %s1314_s26 = scalar_lea.vmem %s1129_s25, 16  ;;  %s1318_s27 = scalar_lea.vmem %s1129_s25, 32 }
 0x284   :  { %v1032_v1 = vmax.f32 %v998_v0, %v1016_v55  ;;  %v1024_v44 = vmax.f32 %v966_v3, %v1008_v37  ;;  %v1021_v0 = vmax.f32 %v955_v42, %v1005_v24  ;;  %v1019_v60 = vmax.f32 %v947_v32, %v1003_v22  ;;  %v1038_v59 = vpop.permute.xlu0 %1037  ;;  %p1315_p0 = scmp.ne.s32.totalorder %s1129_s25, %s1314_s26  ;;  %p1320_p2 = scmp.lt.s32.totalorder %s1318_s27, %s1314_s26 }
 0x285   :  { %v1018_v39 = vmax.f32 %v942_v40, %v1002_v62  ;;  %v1017_v23 = vmax.f32 %v939_v31, %v1001_v7  ;;  %v1040_v55 = vlaneseq }
 0x286   :  { %1221 = vmatpush3.msra.mxu1 %v1032_v1  ;;  %p1321_p3 = por %p1320_p2, %p1319_p1 }
 0x287   :  { %1222 = vmatprep.subr.mxu1 %v1338_v12  ;;  %v1041_v56 = vshrl.u32 %v1040_v55, 7 }
 0x288   :  { %1223 = vmatpush3.msra.mxu1 %v1031_v25  ;;  %p1322_p4 = pnand %p1321_p3, %p1315_p0 }
 0x289   :  { %1224 = vmatprep.subr.mxu1 %v1338_v12  ;;  %v1042_v2 = vsub.s32 0, %v1041_v56 }
 0x28a   :  { %1225 = vmatpush3.msra.mxu1 %v1030_v16 }
 0x28b   :  { %1226 = vmatprep.subr.mxu1 %v1338_v12  ;;  %v1043_v1 = vrot.slane %v1038_v59, %v1042_v2 }
 0x28c   :  { %1227 = vmatpush3.msra.mxu1 %v1029_v4 }
 0x28d   :  { %1228 = vmatprep.subr.mxu1 %v1338_v12 }
 0x28e   :  { %1229 = vmatpush3.msra.mxu1 %v1028_v18 }
 0x28f   :  { %1230 = vmatprep.subr.mxu1 %v1338_v12 }
 0x290   :  { %1231 = vmatpush3.msra.mxu1 %v1027_v35 }
 0x291   :  { %1232 = vmatprep.subr.mxu1 %v1338_v12 }
 0x292   :  { %1233 = vmatpush3.msra.mxu1 %v1026_v61 }
 0x293   :  { %1234 = vmatprep.subr.mxu1 %v1338_v12 }
 0x294   :  { %1235 = vmatpush3.msra.mxu1 %v1025_v30 }
 0x295   :  { %1236 = vmatprep.subr.mxu1 %v1338_v12 }
 0x296   :  { %1237 = vmatpush3.msra.mxu1 %v1024_v44 }
 0x297   :  { %1238 = vmatprep.subr.mxu1 %v1338_v12 }
 0x298   :  { %1239 = vmatpush3.msra.mxu1 %v1023_v28 }
 0x299   :  { %1240 = vmatprep.subr.mxu1 %v1338_v12 }
 0x29a   :  { %1241 = vmatpush3.msra.mxu1 %v1022_v6 }
 0x29b   :  { %1242 = vmatprep.subr.mxu1 %v1338_v12 }
 0x29c   :  { %1243 = vmatpush3.msra.mxu1 %v1021_v0 }
 0x29d   :  { %1244 = vmatprep.subr.mxu1 %v1338_v12 }
 0x29e   :  { %1245 = vmatpush3.msra.mxu1 %v1020_v13 }
 0x29f   :  { %1246 = vmatprep.subr.mxu1 %v1338_v12 }
 0x2a0   :  { %1247 = vmatpush3.msra.mxu1 %v1019_v60 }
 0x2a1   :  { %1248 = vmatprep.subr.mxu1 %v1338_v12 }
 0x2a2   :  { %1249 = vmatpush3.msra.mxu1 %v1018_v39 }
 0x2a3   :  { %1250 = vmatprep.subr.mxu1 %v1338_v12 }
 0x2a4   :  { %1251 = vmatpush3.msra.mxu1 %v1017_v23 }
 0x2a5   :  { %1253 = vmatmul.mubr.f32.vlgmr.msra.gmra.mxu1 %v1033_v52 }
 0x365   :  { %v1110_v5 = vpop.f32.mrf.mxu1 }
 0x366   :  { %v1111_v57 = vadd.f32 %v1110_v5, %v1043_v1 }
 0x367   :  { %v1254_v45 = vpop.f32.mrf.mxu1 }
 0x368   :  { %v1138_v46 = vclamps-f32 %v1111_v57, 30.0 }
 0x36a   :  { %v1116_v26 = vsub.f32 0.0, %v1138_v46 }
 0x36c   :  { %v1117_v25 = vmul.f32 1.442695, %v1116_v26 }
 0x36e   :  { %1310 = vpow2.f32 %v1117_v25 }
 0x37b   :  { %v1311_v47 = vpop.eup %1310 }
 0x37c   :  { %v1119_v20 = vadd.f32 1.0, %v1311_v47 }
 0x37e   :  { %1312 = vrcp.f32 %v1119_v20 }
 0x38b   :  { %v1313_v12 = vpop.eup %1312 }
 0x38c   :  { %1121 = vst [vmem:[#allocation3] sm:$0x1] %v1313_v12 }
 0x38d   :  { %1325 = shalt.err (!%p1322_p4)
}
 0x38e   :  { %1131 = dma.vmem_to_hbm [thread:$0]  %s1129_s25, 16, %s2047_s7, [#allocation4]  }
 0x38f   :  { %1334 = dma.done.wait [#allocation4], 16  }
 0x390   :  { %1335 = vsyncadd [#allocation4], 4294967280 }
 0x391   :  { %1135 = vsyncpa [#allocation4], 1 }

// kernel: tpu_custom_call.1
= control target key start
LH: loop header
LB: loop body
LE: loop exit
PB: predicated region body
PF: predicated region fallthrough
CT: control target
= control target key end

     0   :  { %s2040_s0 = inlined_call_operand.vmem [shape: f32[2,128], index: 0, kind: input, shape index: {}]   ;;  %s2041_s1 = inlined_call_operand.vmem [shape: f32[256,2], index: 1, kind: input, shape index: {}]   ;;  %s2042_s2 = inlined_call_operand.vmem [shape: f32[256,1], index: 2, kind: input, shape index: {}]   ;;  %s2043_s3 = inlined_call_operand.vmem [shape: f32[128,256], index: 3, kind: input, shape index: {}]   ;;  %s2044_s4 = inlined_call_operand.vmem [shape: f32[128,1], index: 4, kind: input, shape index: {}]   ;;  %s2045_s5 = inlined_call_operand.vmem [shape: f32[1,128], index: 5, kind: input, shape index: {}]   ;;  %s2046_s6 = inlined_call_operand.<no memory space> [shape: f32[1,1], index: 6, kind: input, shape index: {}]   ;;  %s2047_s7 = inlined_call_operand.hbm [shape: f32[1,128], index: 7, kind: output, shape index: {}]  }
   0x1   :  { %v12_v0 = vstv %s2046_s6 }
   0x2   :  { %13 = vst [vmem:[#allocation2] sm:$0x1] %v12_v0 }
   0x3   :  { %v62_v1 = vld [vmem:[%s2041_s1 + $0xf0] sm:$0xff]  ;;  %v1336_v3 = vmov 1   ;;  %v63_v4 = vld [vmem:[%s2041_s1 + $0xf8] sm:$0xff]  ;;  %v1401_v5 = vld [vmem:[%s2041_s1 + $0x60] sm:$0xff]  ;;  %v1337_v8 = vmov 0  }
   0x4   :  { %v1390_v2 = vld [vmem:[%s2041_s1 + $0x70] sm:$0xff]  ;;  %1278 = vset.pattern.permute.xlu0 %v1336_v3  ;;  %1276 = vset.pattern.permute.xlu1 %v1336_v3  ;;  %v47_v7 = vld [vmem:[%s2041_s1 + $0x78] sm:$0xff] }
   0x5   :  { %381 = vperm.xlu1 %1276, %v62_v1   ;;  %317 = vperm.xlu0 %1278, %v1390_v2   ;;  %v58_v6 = vld [vmem:[%s2041_s1 + $0xd0] sm:$0xff] }
   0x6   :  { %v42_v9 = vld [vmem:[%s2041_s1 + $0x50] sm:$0xff] }
   0x9   :  { %385 = vperm.xlu1 %1276, %v63_v4   ;;  %309 = vperm.xlu0 %1278, %v1401_v5  }
   0xd   :  { %1277 = vset.pattern.permute.xlu1 %v1337_v8  ;;  %365 = vperm.xlu0 %1278, %v58_v6  }
   0xe   :  { %141 = vperm.xlu1 %1277, %v47_v7  }
  0x11   :  { %301 = vperm.xlu0 %1278, %v42_v9  }
  0x12   :  { %14 = vsyncpa [#allocation4], 0  ;;  %1279 = vset.pattern.permute.xlu1 %v1336_v3  ;;  %v1418_v10 = vld [vmem:[%s2041_s1 + $0xc0] sm:$0xff]  ;;  %v1434_v13 = vld [vmem:[%s2041_s1 + $0xb0] sm:$0xff]  ;;  %vm1339_vm0 = vmmov 0  }
  0x13   :  { %321 = vperm.xlu1 %1279, %v47_v7   ;;  %v60_v11 = vld [vmem:[%s2041_s1 + $0xe0] sm:$0xff]  ;;  %v61_v14 = vld [vmem:[%s2041_s1 + $0xe8] sm:$0xff]  ;;  %v1444_v15 = vld [vmem:[%s2041_s1 + $0x30] sm:$0xff] }
  0x14   :  { %v1427_v12 = vld [vmem:[%s2041_s1 + $0x40] sm:$0xff]  ;;  %v487_v17 = vld [vmem:[%s2042_s2 + $0xf8] sm:$0xff]  ;;  %v45_v19 = vld [vmem:[%s2041_s1 + $0x68] sm:$0xff] }
  0x15   :  { %357 = vperm.xlu0 %1278, %v1418_v10   ;;  %v1450_v16 = vld [vmem:[%s2041_s1 + $0xa0] sm:$0xff]  ;;  %v1469_v20 = vld [vmem:[%s2041_s1 + $0x90] sm:$0xff]  ;;  %v59_v25 = vld [vmem:[%s2041_s1 + $0xd8] sm:$0xff] }
  0x16   :  { %v1460_v18 = vld [vmem:[%s2041_s1 + $0x20] sm:$0xff]  ;;  %v1476_v21 = vld [vmem:[%s2041_s1 + $0x10] sm:$0xff]  ;;  %v43_v27 = vld [vmem:[%s2041_s1 + $0x58] sm:$0xff] }
  0x17   :  { %1280 = vset.pattern.permute.xlu1 %v1337_v8  ;;  %v470_v22 = vld [vmem:[%s2042_s2 + $0x70] sm:$0xff]  ;;  %v1485_v23 = vld [vmem:[%s2041_s1 + $0x80] sm:$0xff]  ;;  %v471_v29 = vld [vmem:[%s2042_s2 + $0x78] sm:$0xff] }
  0x18   :  { %206 = vperm.xlu1 %1280, %v60_v11   ;;  %v1492_v24 = vld [vmem:[%s2041_s1] sm:$0xff]  ;;  %v486_v28 = vld [vmem:[%s2042_s2 + $0xf0] sm:$0xff]  ;;  %v485_v31 = vld [vmem:[%s2042_s2 + $0xe8] sm:$0xff] }
  0x19   :  { %293 = vperm.xlu0 %1278, %v1427_v12   ;;  %v484_v26 = vld [vmem:[%s2042_s2 + $0xe0] sm:$0xff]  ;;  %v469_v32 = vld [vmem:[%s2042_s2 + $0x68] sm:$0xff]  ;;  %v483_v34 = vld [vmem:[%s2042_s2 + $0xd8] sm:$0xff] }
  0x1a   :  { %v468_v30 = vld [vmem:[%s2042_s2 + $0x60] sm:$0xff]  ;;  %v57_v33 = vld [vmem:[%s2041_s1 + $0xc8] sm:$0xff]  ;;  %v467_v35 = vld [vmem:[%s2042_s2 + $0x58] sm:$0xff] }
  0x1b   :  { %v482_v36 = vld [vmem:[%s2042_s2 + $0xd0] sm:$0xff]  ;;  %v481_v37 = vld [vmem:[%s2042_s2 + $0xc8] sm:$0xff]  ;;  %v479_v40 = vld [vmem:[%s2042_s2 + $0xb8] sm:$0xff] }
  0x1c   :  { %1281 = vset.pattern.permute.xlu1 %v1336_v3  ;;  %v465_v38 = vld [vmem:[%s2042_s2 + $0x48] sm:$0xff]  ;;  %v463_v41 = vld [vmem:[%s2042_s2 + $0x38] sm:$0xff]  ;;  %v466_v43 = vld [vmem:[%s2042_s2 + $0x50] sm:$0xff] }
  0x1d   :  { %373 = vperm.xlu1 %1281, %v60_v11   ;;  %349 = vperm.xlu0 %1278, %v1434_v13   ;;  %v41_v39 = vld [vmem:[%s2041_s1 + $0x48] sm:$0xff]  ;;  %v475_v45 = vld [vmem:[%s2042_s2 + $0x98] sm:$0xff]  ;;  %v456_v52 = vld [vmem:[%s2042_s2] sm:$0xff] }
  0x1e   :  { %v477_v42 = vld [vmem:[%s2042_s2 + $0xa8] sm:$0xff]  ;;  %v55_v48 = vld [vmem:[%s2041_s1 + $0xb8] sm:$0xff]  ;;  %v480_v55 = vld [vmem:[%s2042_s2 + $0xc0] sm:$0xff] }
  0x1f   :  { %v461_v44 = vld [vmem:[%s2042_s2 + $0x28] sm:$0xff]  ;;  %v459_v49 = vld [vmem:[%s2042_s2 + $0x18] sm:$0xff] }
  0x20   :  { %v823_v56 = vld [vmem:[%s2044_s4 + $0x78] sm:$0xff]  ;;  %v821_v59 = vld [vmem:[%s2044_s4 + $0x68] sm:$0xff] }
  0x21   :  { %377 = vperm.xlu1 %1281, %v61_v14   ;;  %285 = vperm.xlu0 %1278, %v1444_v15   ;;  %v39_v62 = vld [vmem:[%s2041_s1 + $0x38] sm:$0xff] }
  0x22   :  { %v819_v63 = vld [vmem:[%s2044_s4 + $0x58] sm:$0xff] }
  0x25   :  { %1282 = vset.pattern.permute.xlu1 %v1337_v8  ;;  %341 = vperm.xlu0 %1278, %v1450_v16  }
  0x26   :  { %645 = vperm.xlu1 %1282, %v487_v17   ;;  %v53_v17 = vld [vmem:[%s2041_s1 + $0xa8] sm:$0xff] }
  0x29   :  { %277 = vperm.xlu0 %1278, %v1460_v18  }
  0x2a   :  { %131 = vperm.xlu1 %1282, %v45_v19  }
  0x2d   :  { %333 = vperm.xlu0 %1278, %v1469_v20  }
  0x2e   :  { %1283 = vset.pattern.permute.xlu1 %v1336_v3 }
  0x2f   :  { %313 = vperm.xlu1 %1283, %v45_v19   ;;  %v809_v19 = vld [vmem:[%s2044_s4 + $0x8] sm:$0xff] }
  0x31   :  { %269 = vperm.xlu0 %1278, %v1476_v21  }
  0x33   :  { %1284 = vset.pattern.permute.xlu1 %v1337_v8 }
  0x34   :  { %560 = vperm.xlu1 %1284, %v470_v22  }
  0x35   :  { %325 = vperm.xlu0 %1278, %v1485_v23  }
  0x38   :  { %196 = vperm.xlu1 %1284, %v58_v6  }
  0x39   :  { %261 = vperm.xlu0 %1278, %v1492_v24  }
  0x3c   :  { %201 = vperm.xlu1 %1284, %v59_v25  }
  0x3d   :  { %1307 = vset.pattern.permute.xlu0 %v1337_v8 }
  0x3e   :  { %216 = vperm.xlu0 %1307, %v62_v1   ;;  %v817_v1 = vld [vmem:[%s2044_s4 + $0x48] sm:$0xff] }
  0x40   :  { %1285 = vset.pattern.permute.xlu1 %v1336_v3 }
  0x41   :  { %369 = vperm.xlu1 %1285, %v59_v25  }
  0x42   :  { %221 = vperm.xlu0 %1307, %v63_v4  }
  0x45   :  { %1286 = vset.pattern.permute.xlu1 %v1337_v8 }
  0x46   :  { %630 = vperm.xlu1 %1286, %v484_v26   ;;  %136 = vperm.xlu0 %1307, %v1390_v2  }
  0x4a   :  { %116 = vperm.xlu1 %1286, %v42_v9   ;;  %211 = vperm.xlu0 %1307, %v61_v14   ;;  %v464_v9 = vld [vmem:[%s2042_s2 + $0x40] sm:$0xff] }
  0x4e   :  { %121 = vperm.xlu1 %1286, %v43_v27   ;;  %640 = vperm.xlu0 %1307, %v486_v28   ;;  %v478_v28 = vld [vmem:[%s2042_s2 + $0xb0] sm:$0xff] }
  0x52   :  { %1287 = vset.pattern.permute.xlu1 %v1336_v3  ;;  %126 = vperm.xlu0 %1307, %v1401_v5   ;;  %v815_v5 = vld [vmem:[%s2044_s4 + $0x38] sm:$0xff] }
  0x53   :  { %305 = vperm.xlu1 %1287, %v43_v27  }
  0x56   :  { %565 = vperm.xlu0 %1307, %v471_v29  }
  0x57   :  { %1288 = vset.pattern.permute.xlu1 %v1337_v8 }
  0x58   :  { %550 = vperm.xlu1 %1288, %v468_v30  }
  0x5a   :  { %635 = vperm.xlu0 %1307, %v485_v31  }
  0x5c   :  { %186 = vperm.xlu1 %1288, %v1418_v10   ;;  %v813_v10 = vld [vmem:[%s2044_s4 + $0x28] sm:$0xff] }
  0x5e   :  { %555 = vperm.xlu0 %1307, %v469_v32  }
  0x60   :  { %191 = vperm.xlu1 %1288, %v57_v33  }
  0x62   :  { %625 = vperm.xlu0 %1307, %v483_v34  }
  0x64   :  { %1289 = vset.pattern.permute.xlu1 %v1336_v3 }
  0x65   :  { %361 = vperm.xlu1 %1289, %v57_v33   ;;  %v37_v33 = vld [vmem:[%s2041_s1 + $0x28] sm:$0xff] }
  0x66   :  { %545 = vperm.xlu0 %1307, %v467_v35  }
  0x69   :  { %1290 = vset.pattern.permute.xlu1 %v1337_v8 }
  0x6a   :  { %620 = vperm.xlu1 %1290, %v482_v36   ;;  %615 = vperm.xlu0 %1307, %v481_v37   ;;  %v1687_v36 = vld [vmem:[%s2040_s0] ss:$0 sm:$0xff] }
  0x6e   :  { %106 = vperm.xlu1 %1290, %v1427_v12   ;;  %535 = vperm.xlu0 %1307, %v465_v38  }
  0x72   :  { %111 = vperm.xlu1 %1290, %v41_v39   ;;  %605 = vperm.xlu0 %1307, %v479_v40  }
  0x76   :  { %1291 = vset.pattern.permute.xlu1 %v1336_v3  ;;  %525 = vperm.xlu0 %1307, %v463_v41  }
  0x77   :  { %297 = vperm.xlu1 %1291, %v41_v39  }
  0x7a   :  { %595 = vperm.xlu0 %1307, %v477_v42   ;;  %v462_v42 = vld [vmem:[%s2042_s2 + $0x30] sm:$0xff] }
  0x7b   :  { %1292 = vset.pattern.permute.xlu1 %v1337_v8 }
  0x7c   :  { %540 = vperm.xlu1 %1292, %v466_v43  }
  0x7e   :  { %515 = vperm.xlu0 %1307, %v461_v44  }
  0x80   :  { %v1571_v46 = vpop.permute.xlu1 %381  ;;  %176 = vperm.xlu1 %1292, %v1434_v13   ;;  %v1574_v47 = vpop.permute.xlu0 %317  ;;  %v811_v13 = vld [vmem:[%s2044_s4 + $0x18] sm:$0xff] }
  0x82   :  { %585 = vperm.xlu0 %1307, %v475_v45  }
  0x84   :  { %v1582_v50 = vpop.permute.xlu1 %385  ;;  %181 = vperm.xlu1 %1292, %v55_v48   ;;  %v1584_v51 = vpop.permute.xlu0 %309 }
  0x86   :  { %505 = vperm.xlu0 %1307, %v459_v49  }
  0x88   :  { %1293 = vset.pattern.permute.xlu1 %v1336_v3  ;;  %v1590_v53 = vpop.permute.xlu0 %365 }
  0x89   :  { %v1592_v54 = vpop.permute.xlu1 %141  ;;  %353 = vperm.xlu1 %1293, %v55_v48  }
  0x8a   :  { %490 = vperm.xlu0 %1307, %v456_v52  }
  0x8c   :  { %v1600_v57 = vpop.permute.xlu0 %301 }
  0x8d   :  { %1294 = vset.pattern.permute.xlu1 %v1337_v8 }
  0x8e   :  { %v1603_v58 = vpop.permute.xlu1 %321  ;;  %610 = vperm.xlu1 %1294, %v480_v55   ;;  %901 = vperm.xlu0 %1307, %v823_v56  }
  0x90   :  { %v1608_v60 = vpop.permute.xlu0 %357 }
  0x92   :  { %96 = vperm.xlu1 %1294, %v1444_v15   ;;  %891 = vperm.xlu0 %1307, %v821_v59  }
  0x93   :  { %v1611_v61 = vpop.permute.xlu1 %206 }
  0x94   :  { %v1619_v0 = vpop.permute.xlu0 %293 }
  0x96   :  { %101 = vperm.xlu1 %1294, %v39_v62   ;;  %881 = vperm.xlu0 %1307, %v819_v63   ;;  %v51_v63 = vld [vmem:[%s2041_s1 + $0x98] sm:$0xff] }
  0x98   :  { %v1624_v2 = vpop.permute.xlu1 %373  ;;  %v1626_v4 = vpop.permute.xlu0 %349 }
  0x9a   :  { %1295 = vset.pattern.permute.xlu1 %v1336_v3  ;;  %871 = vperm.xlu0 %1307, %v817_v1  }
  0x9b   :  { %289 = vperm.xlu1 %1295, %v39_v62  }
  0x9c   :  { %v1632_v6 = vpop.permute.xlu1 %377  ;;  %v1634_v7 = vpop.permute.xlu0 %285 }
  0x9e   :  { %861 = vperm.xlu0 %1307, %v815_v5  }
  0x9f   :  { %1296 = vset.pattern.permute.xlu1 %v1337_v8 }
  0xa0   :  { %530 = vperm.xlu1 %1296, %v464_v9   ;;  %v1643_v11 = vpop.permute.xlu0 %341 }
  0xa1   :  { %v646_v12 = vpop.permute.xlu1 %645 }
  0xa2   :  { %851 = vperm.xlu0 %1307, %v813_v10  }
  0xa4   :  { %166 = vperm.xlu1 %1296, %v1450_v16   ;;  %v1649_v14 = vpop.permute.xlu0 %277  ;;  %v1034_v16 = vld [vmem:[#allocation2] sm:$0x1] }
  0xa5   :  { %v1651_v15 = vpop.permute.xlu1 %131 }
  0xa6   :  { %841 = vperm.xlu0 %1307, %v811_v13   ;;  %v256_v13 = vmul.f32 %v1687_v36, %v1611_v61 }
  0xa8   :  { %171 = vperm.xlu1 %1296, %v53_v17   ;;  %v1659_v22 = vpop.permute.xlu0 %333 }
  0xaa   :  { %v1661_v25 = vpop.permute.xlu1 %313  ;;  %831 = vperm.xlu0 %1307, %v809_v19  }
  0xac   :  { %1297 = vset.pattern.permute.xlu1 %v1336_v3  ;;  %v1664_v26 = vpop.permute.xlu0 %269 }
  0xad   :  { %345 = vperm.xlu1 %1297, %v53_v17  }
  0xae   :  { %1037 = vperm.xlu0 %1307, %v1034_v16  }
  0xaf   :  { %v561_v27 = vpop.permute.xlu1 %560 }
  0xb0   :  { %v1669_v29 = vpop.permute.xlu0 %325 }
  0xb1   :  { %1298 = vset.pattern.permute.xlu1 %v1337_v8 }
  0xb2   :  { %600 = vperm.xlu1 %1298, %v478_v28  }
  0xb3   :  { %v1672_v30 = vpop.permute.xlu1 %196 }
  0xb4   :  { %v1674_v31 = vpop.permute.xlu0 %261 }
  0xb6   :  { %86 = vperm.xlu1 %1298, %v1460_v18   ;;  %v1694_v18 = vld [vmem:[%s2040_s0 + $0x1] ss:$0 sm:$0xff] }
  0xb7   :  { %v1677_v32 = vpop.permute.xlu1 %201  ;;  %v423_v39 = vmul.f32 %v1694_v18, %v1582_v50  ;;  %v422_v49 = vmul.f32 %v1694_v18, %v1571_v46  ;;  %v406_v50 = vmul.f32 %v1694_v18, %v1574_v47  ;;  %v420_v46 = vmul.f32 %v1694_v18, %v1624_v2 }
  0xb8   :  { %v407_v47 = vmul.f32 %v1694_v18, %v1603_v58  ;;  %v421_v61 = vmul.f32 %v1694_v18, %v1632_v6 }
  0xb9   :  { %v217_v34 = vpop.permute.xlu0 %216  ;;  %v452_v58 = vadd.f32 %v420_v46, %v256_v13 }
  0xba   :  { %91 = vperm.xlu1 %1298, %v37_v33   ;;  %v258_v44 = vmul.f32 %v1687_v36, %v217_v34 }
  0xbc   :  { %v1682_v35 = vpop.permute.xlu1 %369  ;;  %v454_v56 = vadd.f32 %v422_v49, %v258_v44  ;;  %v405_v44 = vmul.f32 %v1694_v18, %v1661_v25  ;;  %v241_v49 = vmul.f32 %v1687_v36, %v1651_v15 }
  0xbd   :  { %v222_v37 = vpop.permute.xlu0 %221  ;;  %v419_v13 = vmul.f32 %v1694_v18, %v1682_v35 }
  0xbe   :  { %v259_v38 = vmul.f32 %v1687_v36, %v222_v37  ;;  %1299 = vset.pattern.permute.xlu1 %v1336_v3 }
  0xbf   :  { %281 = vperm.xlu1 %1299, %v37_v33  }
  0xc0   :  { %v455_v43 = vadd.f32 %v423_v39, %v259_v38 }
  0xc1   :  { %v631_v40 = vpop.permute.xlu1 %630  ;;  %v137_v41 = vpop.permute.xlu0 %136 }
  0xc2   :  { %v679_v52 = vadd.f32 %v646_v12, %v455_v43  ;;  %v242_v55 = vmul.f32 %v1687_v36, %v137_v41  ;;  %v243_v12 = vmul.f32 %v1687_v36, %v1592_v54  ;;  %v676_v38 = vadd.f32 %v631_v40, %v452_v58  ;;  %v476_v43 = vld [vmem:[%s2042_s2 + $0xa0] sm:$0xff] }
  0xc3   :  { %1300 = vset.pattern.permute.xlu1 %v1337_v8  ;;  %v418_v58 = vmul.f32 %v1694_v18, %v1590_v53 }
  0xc4   :  { %520 = vperm.xlu1 %1300, %v462_v42   ;;  %v438_v1 = vadd.f32 %v406_v50, %v242_v55  ;;  %v711_v9 = vmul.f32 0.2, %v679_v52  ;;  %v708_v50 = vmul.f32 0.2, %v676_v38 }
  0xc5   :  { %v1703_v45 = vpop.permute.xlu1 %116  ;;  %v212_v48 = vpop.permute.xlu0 %211 }
  0xc6   :  { %v662_v19 = vadd.f32 %v561_v27, %v438_v1  ;;  %v743_v33 = vmax.f32 %v679_v52, %v711_v9  ;;  %v257_v34 = vmul.f32 %v1687_v36, %v212_v48  ;;  %v740_v46 = vmax.f32 %v676_v38, %v708_v50 }
  0xc8   :  { %156 = vperm.xlu1 %1300, %v1469_v20   ;;  %v404_v20 = vmul.f32 %v1694_v18, %v1584_v51  ;;  %v439_v51 = vadd.f32 %v407_v47, %v243_v12  ;;  %v694_v41 = vmul.f32 0.2, %v662_v19  ;;  %v453_v40 = vadd.f32 %v421_v61, %v257_v34  ;;  %v35_v12 = vld [vmem:[%s2041_s1 + $0x18] sm:$0xff]  ;;  %v460_v61 = vld [vmem:[%s2042_s2 + $0x20] sm:$0xff] }
  0xc9   :  { %v1711_v59 = vpop.permute.xlu1 %121  ;;  %v641_v62 = vpop.permute.xlu0 %640  ;;  %v254_v34 = vmul.f32 %v1687_v36, %v1672_v30 }
  0xca   :  { %v678_v5 = vadd.f32 %v641_v62, %v454_v56  ;;  %v726_v62 = vmax.f32 %v662_v19, %v694_v41 }
  0xcc   :  { %v710_v10 = vmul.f32 0.2, %v678_v5  ;;  %161 = vperm.xlu1 %1300, %v51_v63  }
  0xcd   :  { %v127_v17 = vpop.permute.xlu0 %126 }
  0xce   :  { %v742_v16 = vmax.f32 %v678_v5, %v710_v10  ;;  %v240_v28 = vmul.f32 %v1687_v36, %v127_v17  ;;  %v1727_v2 = vpop.permute.xlu1 %305  ;;  %v437_v5 = vadd.f32 %v405_v44, %v241_v49  ;;  %v239_v49 = vmul.f32 %v1687_v36, %v1711_v59  ;;  %v474_v59 = vld [vmem:[%s2042_s2 + $0x90] sm:$0xff] }
  0xd0   :  { %1301 = vset.pattern.permute.xlu1 %v1336_v3  ;;  %v807_v37 = vpack.c.bf16 %v743_v33, %v742_v16  ;;  %v436_v27 = vadd.f32 %v404_v20, %v240_v28  ;;  %v255_v16 = vmul.f32 %v1687_v36, %v1677_v32  ;;  %v450_v32 = vadd.f32 %v418_v58, %v254_v34 }
  0xd1   :  { %337 = vperm.xlu1 %1301, %v51_v63   ;;  %v566_v54 = vpop.permute.xlu0 %565 }
  0xd2   :  { %v663_v39 = vadd.f32 %v566_v54, %v439_v51  ;;  %1139 = vmatprep.subr.bf16.mxu0 %v807_v37  ;;  %1255 = vmatprep.subr.bf16.mxu1 %v807_v37  ;;  %v451_v51 = vadd.f32 %v419_v13, %v255_v16 }
  0xd3   :  { %v551_v42 = vpop.permute.xlu1 %550 }
  0xd4   :  { %v695_v48 = vmul.f32 0.2, %v663_v39  ;;  %v660_v55 = vadd.f32 %v551_v42, %v436_v27 }
  0xd5   :  { %1302 = vset.pattern.permute.xlu1 %v1337_v8  ;;  %v636_v6 = vpop.permute.xlu0 %635 }
  0xd6   :  { %v727_v52 = vmax.f32 %v663_v39, %v695_v48  ;;  %v677_v56 = vadd.f32 %v636_v6, %v453_v40  ;;  %590 = vperm.xlu1 %1302, %v476_v43   ;;  %v692_v47 = vmul.f32 0.2, %v660_v55  ;;  %v49_v48 = vld [vmem:[%s2041_s1 + $0x88] sm:$0xff]  ;;  %v403_v40 = vmul.f32 %v1694_v18, %v1727_v2 }
  0xd7   :  { %v1741_v63 = vpop.permute.xlu1 %186  ;;  %v402_v6 = vmul.f32 %v1694_v18, %v1600_v57 }
  0xd8   :  { %v709_v1 = vmul.f32 0.2, %v677_v56  ;;  %v799_v9 = vpack.c.bf16 %v727_v52, %v726_v62  ;;  %v724_v28 = vmax.f32 %v660_v55, %v692_v47  ;;  %v435_v52 = vadd.f32 %v403_v40, %v239_v49 }
  0xd9   :  { %v556_v25 = vpop.permute.xlu0 %555 }
  0xda   :  { %v741_v10 = vmax.f32 %v677_v56, %v709_v1  ;;  %v661_v20 = vadd.f32 %v556_v25, %v437_v5  ;;  %76 = vperm.xlu1 %1302, %v1476_v21   ;;  %1140 = vmatpush3.bf16.msra.mxu0 %v799_v9 }
  0xdb   :  { %1263 = vmatpush3.bf16.msra.mxu1 %v799_v9  ;;  %v1744_v15 = vpop.permute.xlu1 %191 }
  0xdc   :  { %v693_v17 = vmul.f32 0.2, %v661_v20  ;;  %v806_v19 = vpack.c.bf16 %v741_v10, %v740_v46 }
  0xdd   :  { %v626_v21 = vpop.permute.xlu0 %625 }
  0xde   :  { %v725_v33 = vmax.f32 %v661_v20, %v693_v17  ;;  %81 = vperm.xlu1 %1302, %v35_v12   ;;  %1141 = vmatprep.subr.bf16.mxu0 %v806_v19  ;;  %v675_v38 = vadd.f32 %v626_v21, %v451_v51  ;;  %v33_v20 = vld [vmem:[%s2041_s1 + $0x8] sm:$0xff] }
  0xdf   :  { %1256 = vmatprep.subr.bf16.mxu1 %v806_v19  ;;  %v416_v19 = vmul.f32 %v1694_v18, %v1608_v60 }
  0xe0   :  { %v362_v37 = vpop.permute.xlu1 %361  ;;  %v798_v35 = vpack.c.bf16 %v725_v33, %v724_v28  ;;  %v707_v27 = vmul.f32 0.2, %v675_v38 }
  0xe1   :  { %v546_v50 = vpop.permute.xlu0 %545  ;;  %v417_v46 = vmul.f32 %v1694_v18, %v362_v37 }
  0xe2   :  { %1303 = vset.pattern.permute.xlu1 %v1336_v3  ;;  %1142 = vmatpush3.bf16.msra.mxu0 %v798_v35  ;;  %v739_v41 = vmax.f32 %v675_v38, %v707_v27  ;;  %v659_v56 = vadd.f32 %v546_v50, %v435_v52 }
  0xe3   :  { %1264 = vmatpush3.bf16.msra.mxu1 %v798_v35  ;;  %273 = vperm.xlu1 %1303, %v35_v12   ;;  %v253_v12 = vmul.f32 %v1687_v36, %v1744_v15  ;;  %v458_v15 = vld [vmem:[%s2042_s2 + $0x10] sm:$0xff] }
  0xe4   :  { %v691_v1 = vmul.f32 0.2, %v659_v56 }
  0xe5   :  { %v621_v54 = vpop.permute.xlu1 %620  ;;  %v449_v13 = vadd.f32 %v417_v46, %v253_v12  ;;  %v616_v17 = vpop.permute.xlu0 %615 }
  0xe6   :  { %v674_v53 = vadd.f32 %v621_v54, %v450_v32 }
  0xe7   :  { %1304 = vset.pattern.permute.xlu1 %v1337_v8  ;;  %v673_v28 = vadd.f32 %v616_v17, %v449_v13  ;;  %v414_v13 = vmul.f32 %v1694_v18, %v1626_v4 }
  0xe8   :  { %v706_v30 = vmul.f32 0.2, %v674_v53  ;;  %510 = vperm.xlu1 %1304, %v460_v61  }
  0xe9   :  { %v1762_v39 = vpop.permute.xlu1 %106  ;;  %v705_v58 = vmul.f32 0.2, %v673_v28  ;;  %v536_v27 = vpop.permute.xlu0 %535 }
  0xea   :  { %v738_v42 = vmax.f32 %v674_v53, %v706_v30  ;;  %v457_v53 = vld [vmem:[%s2042_s2 + $0x8] sm:$0xff]  ;;  %v400_v30 = vmul.f32 %v1694_v18, %v1619_v0  ;;  %v747_v0 = vld [vmem:[%s2043_s3 + $0x18] sm:$0xff] }
  0xec   :  { %146 = vperm.xlu1 %1304, %v1485_v23   ;;  %v805_v43 = vpack.c.bf16 %v739_v41, %v738_v42  ;;  %v238_v23 = vmul.f32 %v1687_v36, %v1703_v45  ;;  %v723_v45 = vmax.f32 %v659_v56, %v691_v1  ;;  %v236_v41 = vmul.f32 %v1687_v36, %v1762_v39  ;;  %v761_v39 = vld [vmem:[%s2043_s3 + $0x88] sm:$0xff] }
  0xed   :  { %v112_v44 = vpop.permute.xlu1 %111  ;;  %v606_v12 = vpop.permute.xlu0 %605 }
  0xee   :  { %1143 = vmatprep.subr.bf16.mxu0 %v805_v43  ;;  %1257 = vmatprep.subr.bf16.mxu1 %v805_v43  ;;  %v434_v2 = vadd.f32 %v402_v6, %v238_v23  ;;  %v237_v54 = vmul.f32 %v1687_v36, %v112_v44  ;;  %v822_v44 = vld [vmem:[%s2044_s4 + $0x70] sm:$0xff]  ;;  %v745_v6 = vld [vmem:[%s2043_s3 + $0x8] sm:$0xff]  ;;  %v820_v23 = vld [vmem:[%s2044_s4 + $0x60] sm:$0xff] }
  0xef   :  { %v777_v52 = vpack.c.bf16 %v747_v0, %v745_v6 }
  0xf0   :  { %151 = vperm.xlu1 %1304, %v49_v48  }
  0xf1   :  { %936 = vmatprep.mubr.bf16.mxu0 %v777_v52 }
  0xf2   :  { %v298_v55 = vpop.permute.xlu1 %297 }
  0xf3   :  { %v401_v35 = vmul.f32 %v1694_v18, %v298_v55  ;;  %v763_v55 = vld [vmem:[%s2043_s3 + $0x98] sm:$0xff] }
  0xf4   :  { %1305 = vset.pattern.permute.xlu1 %v1336_v3 }
  0xf5   :  { %329 = vperm.xlu1 %1305, %v49_v48   ;;  %v433_v61 = vadd.f32 %v401_v35, %v237_v54  ;;  %v432_v48 = vadd.f32 %v400_v30, %v236_v41  ;;  %v808_v35 = vld [vmem:[%s2044_s4] sm:$0xff]  ;;  %v398_v54 = vmul.f32 %v1694_v18, %v1634_v7 }
  0xf7   :  { %v541_v62 = vpop.permute.xlu1 %540  ;;  %v657_v43 = vadd.f32 %v536_v27, %v433_v61 }
  0xf8   :  { %v658_v5 = vadd.f32 %v541_v62, %v434_v2  ;;  %v785_v2 = vpack.c.bf16 %v763_v55, %v761_v39  ;;  %v412_v55 = vmul.f32 %v1694_v18, %v1643_v11 }
  0xf9   :  { %1306 = vset.pattern.permute.xlu1 %v1337_v8  ;;  %v689_v49 = vmul.f32 0.2, %v657_v43 }
  0xfa   :  { %v690_v57 = vmul.f32 0.2, %v658_v5  ;;  %580 = vperm.xlu1 %1306, %v474_v59   ;;  %968 = vmatprep.mubr.bf16.mxu1 %v785_v2 }
  0xfb   :  { %v1781_v9 = vpop.permute.xlu1 %176  ;;  %v721_v59 = vmax.f32 %v657_v43, %v689_v49 }
  0xfc   :  { %v722_v25 = vmax.f32 %v658_v5, %v690_v57  ;;  %v818_v5 = vld [vmem:[%s2044_s4 + $0x50] sm:$0xff]  ;;  %v250_v17 = vmul.f32 %v1687_v36, %v1781_v9 }
  0xfd   :  { %v810_v9 = vld [vmem:[%s2044_s4 + $0x10] sm:$0xff] }
  0xfe   :  { %66 = vperm.xlu1 %1306, %v1492_v24   ;;  %v797_v47 = vpack.c.bf16 %v723_v45, %v722_v25  ;;  %v252_v24 = vmul.f32 %v1687_v36, %v1741_v63  ;;  %v472_v63 = vld [vmem:[%s2042_s2 + $0x80] sm:$0xff] }
  0xff   :  { %v1785_v10 = vpop.permute.xlu1 %181 }
 0x100   :  { %1144 = vmatpush3.bf16.msra.mxu0 %v797_v47  ;;  %1265 = vmatpush3.bf16.msra.mxu1 %v797_v47  ;;  %v448_v33 = vadd.f32 %v416_v19, %v252_v24  ;;  %v251_v46 = vmul.f32 %v1687_v36, %v1785_v10  ;;  %v816_v47 = vld [vmem:[%s2044_s4 + $0x40] sm:$0xff]  ;;  %v814_v10 = vld [vmem:[%s2044_s4 + $0x30] sm:$0xff] }
 0x102   :  { %71 = vperm.xlu1 %1306, %v33_v20  }
 0x104   :  { %v354_v16 = vpop.permute.xlu1 %353 }
 0x105   :  { %v415_v57 = vmul.f32 %v1694_v18, %v354_v16  ;;  %v446_v16 = vadd.f32 %v414_v13, %v250_v17 }
 0x106   :  { %1308 = vset.pattern.permute.xlu1 %v1336_v3  ;;  %v737_v3 = vmax.f32 %v673_v28, %v705_v58 }
 0x107   :  { %265 = vperm.xlu1 %1308, %v33_v20   ;;  %v447_v20 = vadd.f32 %v415_v57, %v251_v46 }
 0x109   :  { %v611_v21 = vpop.permute.xlu1 %610  ;;  %v671_v24 = vadd.f32 %v606_v12, %v447_v20 }
 0x10a   :  { %v672_v34 = vadd.f32 %v611_v21, %v448_v33  ;;  %v812_v33 = vld [vmem:[%s2044_s4 + $0x20] sm:$0xff] }
 0x10b   :  { %1309 = vset.pattern.permute.xlu1 %v1337_v8  ;;  %v473_v8 = vld [vmem:[%s2042_s2 + $0x88] sm:$0xff]  ;;  %v703_v21 = vmul.f32 0.2, %v671_v24 }
 0x10c   :  { %v704_v51 = vmul.f32 0.2, %v672_v34  ;;  %500 = vperm.xlu1 %1309, %v458_v15  }
 0x10d   :  { %v1801_v60 = vpop.permute.xlu1 %96 }
 0x10e   :  { %v736_v37 = vmax.f32 %v672_v34, %v704_v51  ;;  %v735_v34 = vmax.f32 %v671_v24, %v703_v21  ;;  %v234_v61 = vmul.f32 %v1687_v36, %v1801_v60 }
 0x110   :  { %570 = vperm.xlu1 %1309, %v472_v63   ;;  %v804_v38 = vpack.c.bf16 %v737_v3, %v736_v37  ;;  %v430_v41 = vadd.f32 %v398_v54, %v234_v61 }
 0x111   :  { %v1807_v32 = vpop.permute.xlu1 %101 }
 0x112   :  { %1145 = vmatprep.subr.bf16.mxu0 %v804_v38  ;;  %1258 = vmatprep.subr.bf16.mxu1 %v804_v38  ;;  %v235_v38 = vmul.f32 %v1687_v36, %v1807_v32 }
 0x114   :  { %575 = vperm.xlu1 %1309, %v473_v8  }
 0x116   :  { %v290_v42 = vpop.permute.xlu1 %289 }
 0x117   :  { %v399_v63 = vmul.f32 %v1694_v18, %v290_v42 }
 0x118   :  { %495 = vperm.xlu1 %1309, %v457_v53   ;;  %v526_v53 = vpop.permute.xlu0 %525 }
 0x119   :  { %v431_v8 = vadd.f32 %v399_v63, %v235_v38 }
 0x11b   :  { %v531_v40 = vpop.permute.xlu1 %530  ;;  %v655_v30 = vadd.f32 %v526_v53, %v431_v8  ;;  %v410_v8 = vmul.f32 %v1694_v18, %v1659_v22 }
 0x11c   :  { %v656_v50 = vadd.f32 %v531_v40, %v432_v48  ;;  %896 = vperm.xlu1 %1309, %v822_v44   ;;  %v596_v52 = vpop.permute.xlu0 %595 }
 0x11d   :  { %v687_v43 = vmul.f32 0.2, %v655_v30 }
 0x11e   :  { %v688_v56 = vmul.f32 0.2, %v656_v50 }
 0x11f   :  { %v1838_v62 = vpop.permute.xlu1 %166  ;;  %v719_v49 = vmax.f32 %v655_v30, %v687_v43 }
 0x120   :  { %v720_v1 = vmax.f32 %v656_v50, %v688_v56  ;;  %886 = vperm.xlu1 %1309, %v820_v23   ;;  %v248_v39 = vmul.f32 %v1687_v36, %v1838_v62 }
 0x122   :  { %v796_v45 = vpack.c.bf16 %v721_v59, %v720_v1  ;;  %v444_v2 = vadd.f32 %v412_v55, %v248_v39 }
 0x123   :  { %v172_v25 = vpop.permute.xlu1 %171 }
 0x124   :  { %876 = vperm.xlu1 %1309, %v818_v5   ;;  %1146 = vmatpush3.bf16.msra.mxu0 %v796_v45  ;;  %v249_v7 = vmul.f32 %v1687_v36, %v172_v25 }
 0x125   :  { %1266 = vmatpush3.bf16.msra.mxu1 %v796_v45 }
 0x128   :  { %v346_v19 = vpop.permute.xlu1 %345  ;;  %866 = vperm.xlu1 %1309, %v816_v47  }
 0x129   :  { %v413_v50 = vmul.f32 %v1694_v18, %v346_v19  ;;  %v516_v19 = vpop.permute.xlu0 %515 }
 0x12b   :  { %v445_v60 = vadd.f32 %v413_v50, %v249_v7 }
 0x12c   :  { %856 = vperm.xlu1 %1309, %v814_v10   ;;  %v396_v10 = vmul.f32 %v1694_v18, %v1649_v14 }
 0x12d   :  { %v601_v28 = vpop.permute.xlu1 %600  ;;  %v669_v56 = vadd.f32 %v596_v52, %v445_v60  ;;  %v586_v38 = vpop.permute.xlu0 %585  ;;  %v394_v60 = vmul.f32 %v1694_v18, %v1664_v26 }
 0x12e   :  { %v670_v15 = vadd.f32 %v601_v28, %v446_v16 }
 0x12f   :  { %v701_v1 = vmul.f32 0.2, %v669_v56 }
 0x130   :  { %v702_v4 = vmul.f32 0.2, %v670_v15  ;;  %846 = vperm.xlu1 %1309, %v812_v33  }
 0x131   :  { %v87_v58 = vpop.permute.xlu1 %86  ;;  %v733_v25 = vmax.f32 %v669_v56, %v701_v1  ;;  %v408_v56 = vmul.f32 %v1694_v18, %v1669_v29  ;;  %v392_v1 = vmul.f32 %v1694_v18, %v1674_v31 }
 0x132   :  { %v734_v51 = vmax.f32 %v670_v15, %v702_v4  ;;  %v232_v11 = vmul.f32 %v1687_v36, %v87_v58 }
 0x134   :  { %836 = vperm.xlu1 %1309, %v810_v9   ;;  %v803_v3 = vpack.c.bf16 %v735_v34, %v734_v51  ;;  %v428_v16 = vadd.f32 %v396_v10, %v232_v11 }
 0x135   :  { %v92_v37 = vpop.permute.xlu1 %91 }
 0x136   :  { %1147 = vmatprep.subr.bf16.mxu0 %v803_v3  ;;  %1259 = vmatprep.subr.bf16.mxu1 %v803_v3  ;;  %v233_v62 = vmul.f32 %v1687_v36, %v92_v37 }
 0x138   :  { %826 = vperm.xlu1 %1309, %v808_v35  }
 0x13a   :  { %v282_v27 = vpop.permute.xlu1 %281 }
 0x13b   :  { %v397_v47 = vmul.f32 %v1694_v18, %v282_v27 }
 0x13d   :  { %v429_v13 = vadd.f32 %v397_v47, %v233_v62 }
 0x13f   :  { %v521_v42 = vpop.permute.xlu1 %520  ;;  %v653_v24 = vadd.f32 %v516_v19, %v429_v13 }
 0x140   :  { %v654_v44 = vadd.f32 %v521_v42, %v430_v41 }
 0x141   :  { %v685_v33 = vmul.f32 0.2, %v653_v24 }
 0x142   :  { %v686_v48 = vmul.f32 0.2, %v654_v44 }
 0x143   :  { %v157_v40 = vpop.permute.xlu1 %156  ;;  %v717_v34 = vmax.f32 %v653_v24, %v685_v33 }
 0x144   :  { %v718_v32 = vmax.f32 %v654_v44, %v686_v48  ;;  %v246_v14 = vmul.f32 %v1687_v36, %v157_v40 }
 0x146   :  { %v795_v6 = vpack.c.bf16 %v719_v49, %v718_v32  ;;  %v442_v61 = vadd.f32 %v410_v8, %v246_v14  ;;  %v749_v14 = vld [vmem:[%s2043_s3 + $0x28] sm:$0xff]  ;;  %v767_v8 = vld [vmem:[%s2043_s3 + $0xb8] sm:$0xff] }
 0x147   :  { %v162_v0 = vpop.permute.xlu1 %161 }
 0x148   :  { %1148 = vmatpush3.bf16.msra.mxu0 %v795_v6  ;;  %1267 = vmatpush3.bf16.msra.mxu1 %v795_v6  ;;  %v247_v58 = vmul.f32 %v1687_v36, %v162_v0  ;;  %v506_v6 = vpop.permute.xlu0 %505 }
 0x14c   :  { %v338_v23 = vpop.permute.xlu1 %337  ;;  %v491_v11 = vpop.permute.xlu0 %490 }
 0x14d   :  { %v411_v51 = vmul.f32 %v1694_v18, %v338_v23 }
 0x14f   :  { %v443_v37 = vadd.f32 %v411_v51, %v247_v58  ;;  %v744_v51 = vld [vmem:[%s2043_s3] sm:$0xff] }
 0x150   :  { %v760_v58 = vld [vmem:[%s2043_s3 + $0x80] sm:$0xff] }
 0x151   :  { %v591_v59 = vpop.permute.xlu1 %590  ;;  %v667_v54 = vadd.f32 %v586_v38, %v443_v37  ;;  %v762_v37 = vld [vmem:[%s2043_s3 + $0x90] sm:$0xff]  ;;  %v765_v38 = vld [vmem:[%s2043_s3 + $0xa8] sm:$0xff] }
 0x152   :  { %v668_v5 = vadd.f32 %v591_v59, %v444_v2 }
 0x153   :  { %v699_v53 = vmul.f32 0.2, %v667_v54 }
 0x154   :  { %v700_v57 = vmul.f32 0.2, %v668_v5 }
 0x155   :  { %v77_v45 = vpop.permute.xlu1 %76  ;;  %v731_v44 = vmax.f32 %v667_v54, %v699_v53 }
 0x156   :  { %v732_v46 = vmax.f32 %v668_v5, %v700_v57  ;;  %v230_v22 = vmul.f32 %v1687_v36, %v77_v45 }
 0x158   :  { %v802_v20 = vpack.c.bf16 %v733_v25, %v732_v46  ;;  %v426_v23 = vadd.f32 %v394_v60, %v230_v22  ;;  %v754_v60 = vld [vmem:[%s2043_s3 + $0x50] sm:$0xff] }
 0x159   :  { %v82_v12 = vpop.permute.xlu1 %81 }
 0x15a   :  { %1149 = vmatprep.subr.bf16.mxu0 %v802_v20  ;;  %1260 = vmatprep.subr.bf16.mxu1 %v802_v20  ;;  %v231_v49 = vmul.f32 %v1687_v36, %v82_v12 }
 0x15e   :  { %v274_v17 = vpop.permute.xlu1 %273 }
 0x15f   :  { %v395_v48 = vmul.f32 %v1694_v18, %v274_v17 }
 0x161   :  { %v427_v50 = vadd.f32 %v395_v48, %v231_v49  ;;  %v753_v48 = vld [vmem:[%s2043_s3 + $0x48] sm:$0xff] }
 0x162   :  { %v769_v49 = vld [vmem:[%s2043_s3 + $0xc8] sm:$0xff] }
 0x163   :  { %v511_v28 = vpop.permute.xlu1 %510  ;;  %v651_v7 = vadd.f32 %v506_v6, %v427_v50 }
 0x164   :  { %v652_v21 = vadd.f32 %v511_v28, %v428_v16 }
 0x165   :  { %v683_v52 = vmul.f32 0.2, %v651_v7 }
 0x166   :  { %v684_v15 = vmul.f32 0.2, %v652_v21 }
 0x167   :  { %v147_v4 = vpop.permute.xlu1 %146  ;;  %v715_v26 = vmax.f32 %v651_v7, %v683_v52  ;;  %v752_v7 = vld [vmem:[%s2043_s3 + $0x40] sm:$0xff]  ;;  %v757_v52 = vld [vmem:[%s2043_s3 + $0x68] sm:$0xff] }
 0x168   :  { %v716_v9 = vmax.f32 %v652_v21, %v684_v15  ;;  %v244_v39 = vmul.f32 %v1687_v36, %v147_v4 }
 0x16a   :  { %v794_v63 = vpack.c.bf16 %v717_v34, %v716_v9  ;;  %v440_v45 = vadd.f32 %v408_v56, %v244_v39  ;;  %v768_v39 = vld [vmem:[%s2043_s3 + $0xc0] sm:$0xff]  ;;  %v773_v56 = vld [vmem:[%s2043_s3 + $0xe8] sm:$0xff] }
 0x16b   :  { %v152_v3 = vpop.permute.xlu1 %151 }
 0x16c   :  { %1150 = vmatpush3.bf16.msra.mxu0 %v794_v63  ;;  %1268 = vmatpush3.bf16.msra.mxu1 %v794_v63  ;;  %v245_v25 = vmul.f32 %v1687_v36, %v152_v3 }
 0x170   :  { %v330_v35 = vpop.permute.xlu1 %329 }
 0x171   :  { %v409_v5 = vmul.f32 %v1694_v18, %v330_v35  ;;  %v751_v35 = vld [vmem:[%s2043_s3 + $0x38] sm:$0xff] }
 0x172   :  { %v779_v53 = vpack.c.bf16 %v751_v35, %v749_v14 }
 0x173   :  { %v441_v29 = vadd.f32 %v409_v5, %v245_v25  ;;  %v774_v25 = vld [vmem:[%s2043_s3 + $0xf0] sm:$0xff] }
 0x175   :  { %v581_v27 = vpop.permute.xlu1 %580 }
 0x176   :  { %v666_v30 = vadd.f32 %v581_v27, %v442_v61  ;;  %v784_v27 = vpack.c.bf16 %v762_v37, %v760_v58 }
 0x178   :  { %v698_v41 = vmul.f32 0.2, %v666_v30 }
 0x179   :  { %v67_v42 = vpop.permute.xlu1 %66 }
 0x17a   :  { %v730_v43 = vmax.f32 %v666_v30, %v698_v41  ;;  %v228_v2 = vmul.f32 %v1687_v36, %v67_v42  ;;  %v787_v30 = vpack.c.bf16 %v767_v8, %v765_v38  ;;  %v748_v41 = vld [vmem:[%s2043_s3 + $0x20] sm:$0xff]  ;;  %v750_v42 = vld [vmem:[%s2043_s3 + $0x30] sm:$0xff] }
 0x17b   :  { %v778_v50 = vpack.c.bf16 %v750_v42, %v748_v41 }
 0x17c   :  { %v801_v32 = vpack.c.bf16 %v731_v44, %v730_v43  ;;  %v424_v47 = vadd.f32 %v392_v1, %v228_v2  ;;  %v764_v43 = vld [vmem:[%s2043_s3 + $0xa0] sm:$0xff]  ;;  %v766_v44 = vld [vmem:[%s2043_s3 + $0xb0] sm:$0xff]  ;;  %v775_v2 = vld [vmem:[%s2043_s3 + $0xf8] sm:$0xff] }
 0x17d   :  { %v72_v40 = vpop.permute.xlu1 %71  ;;  %v786_v6 = vpack.c.bf16 %v766_v44, %v764_v43 }
 0x17e   :  { %1151 = vmatprep.subr.bf16.mxu0 %v801_v32  ;;  %1261 = vmatprep.subr.bf16.mxu1 %v801_v32  ;;  %v648_v19 = vadd.f32 %v491_v11, %v424_v47  ;;  %v229_v31 = vmul.f32 %v1687_v36, %v72_v40  ;;  %v746_v36 = vld [vmem:[%s2043_s3 + $0x10] sm:$0xff]  ;;  %v755_v32 = vld [vmem:[%s2043_s3 + $0x58] sm:$0xff] }
 0x17f   :  { %v776_v61 = vpack.c.bf16 %v746_v36, %v744_v51  ;;  %v771_v40 = vld [vmem:[%s2043_s3 + $0xd8] sm:$0xff]  ;;  %v781_v22 = vpack.c.bf16 %v755_v32, %v753_v48 }
 0x180   :  { %v680_v21 = vmul.f32 0.2, %v648_v19 }
 0x182   :  { %v266_v0 = vpop.permute.xlu1 %265  ;;  %v712_v3 = vmax.f32 %v648_v19, %v680_v21 }
 0x183   :  { %v393_v62 = vmul.f32 %v1694_v18, %v266_v0  ;;  %v789_v0 = vpack.c.bf16 %v771_v40, %v769_v49 }
 0x185   :  { %v425_v28 = vadd.f32 %v393_v62, %v229_v31 }
 0x187   :  { %v501_v55 = vpop.permute.xlu1 %500 }
 0x188   :  { %v650_v59 = vadd.f32 %v501_v55, %v426_v23  ;;  %v770_v23 = vld [vmem:[%s2043_s3 + $0xd0] sm:$0xff]  ;;  %v759_v55 = vld [vmem:[%s2043_s3 + $0x78] sm:$0xff] }
 0x189   :  { %v788_v1 = vpack.c.bf16 %v770_v23, %v768_v39  ;;  %v783_v5 = vpack.c.bf16 %v759_v55, %v757_v52 }
 0x18a   :  { %v682_v57 = vmul.f32 0.2, %v650_v59 }
 0x18b   :  { %v571_v46 = vpop.permute.xlu1 %570 }
 0x18c   :  { %v714_v20 = vmax.f32 %v650_v59, %v682_v57  ;;  %v664_v12 = vadd.f32 %v571_v46, %v440_v45  ;;  %v780_v59 = vpack.c.bf16 %v754_v60, %v752_v7  ;;  %v791_v57 = vpack.c.bf16 %v775_v2, %v773_v56  ;;  %v756_v45 = vld [vmem:[%s2043_s3 + $0x60] sm:$0xff]  ;;  %v758_v46 = vld [vmem:[%s2043_s3 + $0x70] sm:$0xff] }
 0x18d   :  { %v782_v47 = vpack.c.bf16 %v758_v46, %v756_v45 }
 0x18e   :  { %v793_v13 = vpack.c.bf16 %v715_v26, %v714_v20  ;;  %v696_v10 = vmul.f32 0.2, %v664_v12  ;;  %v772_v26 = vld [vmem:[%s2043_s3 + $0xe0] sm:$0xff] }
 0x18f   :  { %v576_v17 = vpop.permute.xlu1 %575  ;;  %v790_v20 = vpack.c.bf16 %v774_v25, %v772_v26 }
 0x190   :  { %v665_v24 = vadd.f32 %v576_v17, %v441_v29  ;;  %1152 = vmatpush3.bf16.msra.mxu0 %v793_v13  ;;  %1269 = vmatpush3.bf16.msra.mxu1 %v793_v13  ;;  %v728_v15 = vmax.f32 %v664_v12, %v696_v10  ;;  %v1338_v12 = vmov 0.0  }
 0x192   :  { %v697_v16 = vmul.f32 0.2, %v665_v24 }
 0x193   :  { %v496_v33 = vpop.permute.xlu1 %495 }
 0x194   :  { %v729_v4 = vmax.f32 %v665_v24, %v697_v16  ;;  %v649_v9 = vadd.f32 %v496_v33, %v425_v28 }
 0x196   :  { %v681_v34 = vmul.f32 0.2, %v649_v9  ;;  %v800_v18 = vpack.c.bf16 %v729_v4, %v728_v15  ;;  %v902_v4 = vpop.permute.xlu0 %901 }
 0x198   :  { %v713_v63 = vmax.f32 %v649_v9, %v681_v34  ;;  %1153 = vmatprep.subr.bf16.mxu0 %v800_v18  ;;  %1262 = vmatprep.subr.bf16.mxu1 %v800_v18  ;;  %v897_v18 = vpop.permute.xlu1 %896 }
 0x19a   :  { %v792_v54 = vpack.c.bf16 %v713_v63, %v712_v3  ;;  %v892_v58 = vpop.permute.xlu0 %891 }
 0x19c   :  { %1154 = vmatpush3.bf16.msra.mxu0 %v792_v54  ;;  %1270 = vmatpush3.bf16.msra.mxu1 %v792_v54  ;;  %v887_v35 = vpop.permute.xlu1 %886 }
 0x19d   :  { %1220 = vmatprep.subr.mxu1 %v1338_v12 }
 0x19f   :  { %937 = vmatmul.mubr.bf16.vlgmr.msra.gmra.mxu0 %v776_v61  ;;  %969 = vmatmul.mubr.bf16.vlgmr.msra.gmra.mxu1 %v784_v27  ;;  %v882_v61 = vpop.permute.xlu0 %881 }
 0x1a0   :  { %944 = vmatprep.mubr.bf16.mxu0 %v779_v53  ;;  %976 = vmatprep.mubr.bf16.mxu1 %v787_v30  ;;  %v877_v41 = vpop.permute.xlu1 %876 }
 0x1a4   :  { %v867_v7 = vpop.permute.xlu1 %866 }
 0x1a7   :  { %945 = vmatmul.mubr.bf16.gmra.mxu0 %v778_v50  ;;  %977 = vmatmul.mubr.bf16.gmra.mxu1 %v786_v6  ;;  %v872_v50 = vpop.permute.xlu0 %871 }
 0x1a8   :  { %952 = vmatprep.mubr.bf16.mxu0 %v781_v22  ;;  %984 = vmatprep.mubr.bf16.mxu1 %v789_v0 }
 0x1af   :  { %953 = vmatmul.mubr.bf16.gmra.mxu0 %v780_v59  ;;  %985 = vmatmul.mubr.bf16.gmra.mxu1 %v788_v1 }
 0x1b0   :  { %960 = vmatprep.mubr.bf16.mxu0 %v783_v5  ;;  %992 = vmatprep.mubr.bf16.mxu1 %v791_v57  ;;  %v862_v5 = vpop.permute.xlu0 %861 }
 0x1b7   :  { %961 = vmatmul.mubr.bf16.gmra.mxu0 %v782_v47  ;;  %993 = vmatmul.mubr.bf16.gmra.mxu1 %v790_v20  ;;  %v857_v47 = vpop.permute.xlu1 %856 }
 0x1b8   :  { %1252 = vmatprep.mubr.msk.f32.mxu1 %vm1339_vm0, %v1338_v12 }
 0x25f   :  { %v1989_v62 = vpop.f32.mrf.mxu0  ;;  %v1179_v29 = vpop.f32.mrf.mxu1 }
 0x261   :  { %v1991_v13 = vpop.f32.mrf.mxu0  ;;  %v1180_v11 = vpop.f32.mrf.mxu1 }
 0x262   :  { %v1181_v45 = vadd.f32 %v1180_v11, %v1179_v29  ;;  %v852_v29 = vpop.permute.xlu0 %851 }
 0x263   :  { %v1993_v17 = vpop.f32.mrf.mxu0  ;;  %v1182_v19 = vpop.f32.mrf.mxu1 }
 0x265   :  { %v1995_v31 = vpop.f32.mrf.mxu0  ;;  %v1183_v10 = vpop.f32.mrf.mxu1 }
 0x266   :  { %v1184_v56 = vadd.f32 %v1183_v10, %v1182_v19  ;;  %v971_v19 = vadd.f32 %v1181_v45, %v867_v7 }
 0x267   :  { %v1997_v24 = vpop.f32.mrf.mxu0  ;;  %v1185_v16 = vpop.f32.mrf.mxu1 }
 0x268   :  { %v974_v20 = vadd.f32 %v1184_v56, %v872_v50 }
 0x269   :  { %v1999_v28 = vpop.f32.mrf.mxu0  ;;  %v1186_v33 = vpop.f32.mrf.mxu1 }
 0x26a   :  { %v1187_v39 = vadd.f32 %v1186_v33, %v1185_v16  ;;  %v1010_v11 = vmul.f32 0.2, %v974_v20 }
 0x26b   :  { %v2001_v21 = vpop.f32.mrf.mxu0  ;;  %v1188_v15 = vpop.f32.mrf.mxu1 }
 0x26c   :  { %v979_v46 = vadd.f32 %v1187_v39, %v877_v41  ;;  %v1163_v41 = vadd.f32 %v1999_v28, %v1997_v24 }
 0x26d   :  { %v2003_v9 = vpop.f32.mrf.mxu0  ;;  %v1189_v34 = vpop.f32.mrf.mxu1 }
 0x26e   :  { %v1190_v6 = vadd.f32 %v1189_v34, %v1188_v15  ;;  %v1011_v10 = vmul.f32 0.2, %v979_v46 }
 0x26f   :  { %v2005_v51 = vpop.f32.mrf.mxu0  ;;  %v1191_v36 = vpop.f32.mrf.mxu1 }
 0x270   :  { %v982_v2 = vadd.f32 %v1190_v6, %v882_v61  ;;  %v1026_v61 = vmax.f32 %v974_v20, %v1010_v11 }
 0x271   :  { %v2007_v63 = vpop.f32.mrf.mxu0  ;;  %v1192_v3 = vpop.f32.mrf.mxu1 }
 0x272   :  { %v1193_v32 = vadd.f32 %v1192_v3, %v1191_v36  ;;  %v1012_v15 = vmul.f32 0.2, %v982_v2 }
 0x273   :  { %v1170_v37 = vpop.f32.mrf.mxu0  ;;  %v1194_v14 = vpop.f32.mrf.mxu1 }
 0x274   :  { %v987_v23 = vadd.f32 %v1193_v32, %v887_v35  ;;  %v1027_v35 = vmax.f32 %v979_v46, %v1011_v10 }
 0x275   :  { %v1171_v38 = vpop.f32.mrf.mxu0  ;;  %v1195_v8 = vpop.f32.mrf.mxu1 }
 0x276   :  { %v1196_v43 = vadd.f32 %v1195_v8, %v1194_v14  ;;  %v1013_v26 = vmul.f32 0.2, %v987_v23  ;;  %v1172_v36 = vadd.f32 %v1171_v38, %v1170_v37  ;;  %v1009_v14 = vmul.f32 0.2, %v971_v19  ;;  %v842_v38 = vpop.permute.xlu0 %841 }
 0x277   :  { %v1197_v54 = vpop.f32.mrf.mxu1  ;;  %v1173_v27 = vpop.f32.mrf.mxu0  ;;  %v1169_v8 = vadd.f32 %v2007_v63, %v2005_v51 }
 0x278   :  { %v990_v22 = vadd.f32 %v1196_v43, %v892_v58  ;;  %v847_v58 = vpop.permute.xlu1 %846  ;;  %v1160_v43 = vadd.f32 %v1995_v31, %v1993_v17 }
 0x279   :  { %v1198_v53 = vpop.f32.mrf.mxu1  ;;  %v1174_v44 = vpop.f32.mrf.mxu0 }
 0x27a   :  { %v1199_v30 = vadd.f32 %v1198_v53, %v1197_v54  ;;  %v1014_v59 = vmul.f32 0.2, %v990_v22  ;;  %v1175_v34 = vadd.f32 %v1174_v44, %v1173_v27  ;;  %v1166_v27 = vadd.f32 %v2003_v9, %v2001_v21 }
 0x27b   :  { %v1200_v42 = vpop.f32.mrf.mxu1  ;;  %v1176_v60 = vpop.f32.mrf.mxu0  ;;  %v958_v53 = vadd.f32 %v1172_v36, %v852_v29 }
 0x27c   :  { %v995_v49 = vadd.f32 %v1199_v30, %v897_v18  ;;  %v1030_v16 = vmax.f32 %v990_v22, %v1014_v59  ;;  %v1028_v18 = vmax.f32 %v982_v2, %v1012_v15  ;;  %v963_v54 = vadd.f32 %v1175_v34, %v857_v47  ;;  %v837_v63 = vpop.permute.xlu1 %836 }
 0x27d   :  { %v1201_v48 = vpop.f32.mrf.mxu1  ;;  %v1177_v57 = vpop.f32.mrf.mxu0  ;;  %v1025_v30 = vmax.f32 %v971_v19, %v1009_v14  ;;  %v950_v21 = vadd.f32 %v1166_v27, %v842_v38  ;;  %v1006_v9 = vmul.f32 0.2, %v958_v53  ;;  %v947_v32 = vadd.f32 %v1163_v41, %v837_v63 }
 0x27e   :  { %v1202_v40 = vadd.f32 %v1201_v48, %v1200_v42  ;;  %v1015_v52 = vmul.f32 0.2, %v995_v49  ;;  %v1178_v33 = vadd.f32 %v1177_v57, %v1176_v60  ;;  %v955_v42 = vadd.f32 %v1169_v8, %v847_v58 }
 0x27f   :  { %v1007_v51 = vmul.f32 0.2, %v963_v54  ;;  %v1157_v48 = vadd.f32 %v1991_v13, %v1989_v62  ;;  %v1004_v50 = vmul.f32 0.2, %v950_v21  ;;  %v1022_v6 = vmax.f32 %v958_v53, %v1006_v9 }
 0x280   :  { %v998_v0 = vadd.f32 %v1202_v40, %v902_v4  ;;  %v1031_v25 = vmax.f32 %v995_v49, %v1015_v52  ;;  %v1029_v4 = vmax.f32 %v987_v23, %v1013_v26  ;;  %v966_v3 = vadd.f32 %v1178_v33, %v862_v5  ;;  %v832_v49 = vpop.permute.xlu0 %831  ;;  %v827_v17 = vpop.permute.xlu1 %826  ;;  %v1033_v52 = vld [vmem:[%s2045_s5] sm:$0x1]  ;;  %s1340_s5 = smov [#allocation3]  }
 0x281   :  { %v1005_v24 = vmul.f32 0.2, %v955_v42  ;;  %v1023_v28 = vmax.f32 %v963_v54, %v1007_v51  ;;  %v942_v40 = vadd.f32 %v1160_v43, %v832_v49  ;;  %v939_v31 = vadd.f32 %v1157_v48, %v827_v17  ;;  %s1128_s25 = sshll.u32 %s1340_s5, 4  ;;  %s1129_s25 = int_to_ptr.vmem [resolvable:$true] %s1128_s25 }
 0x282   :  { %v1016_v55 = vmul.f32 0.2, %v998_v0  ;;  %v1008_v37 = vmul.f32 0.2, %v966_v3  ;;  %v1003_v22 = vmul.f32 0.2, %v947_v32  ;;  %v1020_v13 = vmax.f32 %v950_v21, %v1004_v50  ;;  %p1319_p1 = scmp.lt.s32.totalorder %s1129_s25, %s1129_s25 }
 0x283   :  { %v1002_v62 = vmul.f32 0.2, %v942_v40  ;;  %v1001_v7 = vmul.f32 0.2, %v939_v31  ;;  %s1314_s26 = scalar_lea.vmem %s1129_s25, 16  ;;  %s1318_s27 = scalar_lea.vmem %s1129_s25, 32 }
 0x284   :  { %v1032_v1 = vmax.f32 %v998_v0, %v1016_v55  ;;  %v1024_v44 = vmax.f32 %v966_v3, %v1008_v37  ;;  %v1021_v0 = vmax.f32 %v955_v42, %v1005_v24  ;;  %v1019_v60 = vmax.f32 %v947_v32, %v1003_v22  ;;  %v1038_v59 = vpop.permute.xlu0 %1037  ;;  %p1315_p0 = scmp.ne.s32.totalorder %s1129_s25, %s1314_s26  ;;  %p1320_p2 = scmp.lt.s32.totalorder %s1318_s27, %s1314_s26 }
 0x285   :  { %v1018_v39 = vmax.f32 %v942_v40, %v1002_v62  ;;  %v1017_v23 = vmax.f32 %v939_v31, %v1001_v7  ;;  %v1040_v55 = vlaneseq }
 0x286   :  { %1221 = vmatpush3.msra.mxu1 %v1032_v1  ;;  %p1321_p3 = por %p1320_p2, %p1319_p1 }
 0x287   :  { %1222 = vmatprep.subr.mxu1 %v1338_v12  ;;  %v1041_v56 = vshrl.u32 %v1040_v55, 7 }
 0x288   :  { %1223 = vmatpush3.msra.mxu1 %v1031_v25  ;;  %p1322_p4 = pnand %p1321_p3, %p1315_p0 }
 0x289   :  { %1224 = vmatprep.subr.mxu1 %v1338_v12  ;;  %v1042_v2 = vsub.s32 0, %v1041_v56 }
 0x28a   :  { %1225 = vmatpush3.msra.mxu1 %v1030_v16 }
 0x28b   :  { %1226 = vmatprep.subr.mxu1 %v1338_v12  ;;  %v1043_v1 = vrot.slane %v1038_v59, %v1042_v2 }
 0x28c   :  { %1227 = vmatpush3.msra.mxu1 %v1029_v4 }
 0x28d   :  { %1228 = vmatprep.subr.mxu1 %v1338_v12 }
 0x28e   :  { %1229 = vmatpush3.msra.mxu1 %v1028_v18 }
 0x28f   :  { %1230 = vmatprep.subr.mxu1 %v1338_v12 }
 0x290   :  { %1231 = vmatpush3.msra.mxu1 %v1027_v35 }
 0x291   :  { %1232 = vmatprep.subr.mxu1 %v1338_v12 }
 0x292   :  { %1233 = vmatpush3.msra.mxu1 %v1026_v61 }
 0x293   :  { %1234 = vmatprep.subr.mxu1 %v1338_v12 }
 0x294   :  { %1235 = vmatpush3.msra.mxu1 %v1025_v30 }
 0x295   :  { %1236 = vmatprep.subr.mxu1 %v1338_v12 }
 0x296   :  { %1237 = vmatpush3.msra.mxu1 %v1024_v44 }
 0x297   :  { %1238 = vmatprep.subr.mxu1 %v1338_v12 }
 0x298   :  { %1239 = vmatpush3.msra.mxu1 %v1023_v28 }
 0x299   :  { %1240 = vmatprep.subr.mxu1 %v1338_v12 }
 0x29a   :  { %1241 = vmatpush3.msra.mxu1 %v1022_v6 }
 0x29b   :  { %1242 = vmatprep.subr.mxu1 %v1338_v12 }
 0x29c   :  { %1243 = vmatpush3.msra.mxu1 %v1021_v0 }
 0x29d   :  { %1244 = vmatprep.subr.mxu1 %v1338_v12 }
 0x29e   :  { %1245 = vmatpush3.msra.mxu1 %v1020_v13 }
 0x29f   :  { %1246 = vmatprep.subr.mxu1 %v1338_v12 }
 0x2a0   :  { %1247 = vmatpush3.msra.mxu1 %v1019_v60 }
 0x2a1   :  { %1248 = vmatprep.subr.mxu1 %v1338_v12 }
 0x2a2   :  { %1249 = vmatpush3.msra.mxu1 %v1018_v39 }
 0x2a3   :  { %1250 = vmatprep.subr.mxu1 %v1338_v12 }
 0x2a4   :  { %1251 = vmatpush3.msra.mxu1 %v1017_v23 }
 0x2a5   :  { %1253 = vmatmul.mubr.f32.vlgmr.msra.gmra.mxu1 %v1033_v52 }
 0x365   :  { %v1110_v5 = vpop.f32.mrf.mxu1 }
 0x366   :  { %v1111_v57 = vadd.f32 %v1110_v5, %v1043_v1 }
 0x367   :  { %v1254_v45 = vpop.f32.mrf.mxu1 }
 0x368   :  { %v1138_v46 = vclamps-f32 %v1111_v57, 30.0 }
 0x36a   :  { %v1116_v26 = vsub.f32 0.0, %v1138_v46 }
 0x36c   :  { %v1117_v25 = vmul.f32 1.442695, %v1116_v26 }
 0x36e   :  { %1310 = vpow2.f32 %v1117_v25 }
 0x37b   :  { %v1311_v47 = vpop.eup %1310 }
 0x37c   :  { %v1119_v20 = vadd.f32 1.0, %v1311_v47 }
 0x37e   :  { %1312 = vrcp.f32 %v1119_v20 }
 0x38b   :  { %v1313_v12 = vpop.eup %1312 }
 0x38c   :  { %1121 = vst [vmem:[#allocation3] sm:$0x1] %v1313_v12 }
 0x38d   :  { %1325 = shalt.err (!%p1322_p4)
}
 0x38e   :  { %1131 = dma.vmem_to_hbm [thread:$0]  %s1129_s25, 16, %s2047_s7, [#allocation4]  }
 0x38f   :  { %1334 = dma.done.wait [#allocation4], 16  }
 0x390   :  { %1335 = vsyncadd [#allocation4], 4294967280 }
 0x391   :  { %1135 = vsyncpa [#allocation4], 1 }

</bundles_post_ra>
